<compile_context>
chip_gen: v7x
topology: tpu7x:2x2x1
jax: 0.10.0
libtpu: 0.0.40
codegen_flags: <defaults>
</compile_context>

<pallas_src>
import functools
import math

import jax
import jax.numpy as jnp
from jax.experimental import pallas as pl
from jax.experimental.pallas import tpu as pltpu


# ----------------------------------------------------------------------------- kernel

def _gra_atten_kernel(x_ref, mask_ref,
                      ln1_a_ref, ln1_b_ref,
                      wqkv_ref, bqkv_ref, wo_ref, bo_ref,
                      ln2_a_ref, ln2_b_ref,
                      wf1_ref, bf1_ref, wf2_ref, bf2_ref,
                      o_ref, *, num_heads, eps):
    TB, J, D = x_ref.shape
    dk = D // num_heads
    inv_sqrt_dk = jnp.float32(1.0 / math.sqrt(dk))

    x = x_ref[...].astype(jnp.float32)          # (TB, J, D)
    x2 = x.reshape(TB * J, D)                   # collapse batch*nodes -> MXU M-dim

    def layernorm(h, a_ref_, b_ref_):
        mean = jnp.mean(h, axis=-1, keepdims=True)
        hc = h - mean
        var = jnp.sum(hc * hc, axis=-1, keepdims=True) / (D - 1)   # unbiased (torch.std)
        return a_ref_[...] * hc / (jnp.sqrt(var) + eps) + b_ref_[...]

    # ---------------- sublayer 0: multi-head self-attention ----------------
    xn = layernorm(x2, ln1_a_ref, ln1_b_ref)                        # (TB*J, D)
    # fused QKV projection: one MXU pass instead of three
    qkv = jnp.dot(xn, wqkv_ref[...], preferred_element_type=jnp.float32) + bqkv_ref[...]

    mask_ok = mask_ref[...][None, :, :] > 0                         # (1, J, J)
    neg = jnp.float32(-1e9)

    heads = []
    for h in range(num_heads):                                      # static unroll
        q = qkv[:, h * dk:(h + 1) * dk].reshape(TB, J, dk)
        k = qkv[:, D + h * dk:D + (h + 1) * dk].reshape(TB, J, dk)
        v = qkv[:, 2 * D + h * dk:2 * D + (h + 1) * dk].reshape(TB, J, dk)
        s = jnp.einsum("bqd,bkd->bqk", q, k,
                       preferred_element_type=jnp.float32) * inv_sqrt_dk
        s = jnp.where(mask_ok, s, neg)                              # masked_fill(mask==0,-1e9)
        s_max = jnp.max(s, axis=-1, keepdims=True)
        e = jnp.exp(s - s_max)
        a = e / jnp.sum(e, axis=-1, keepdims=True)
        heads.append(jnp.einsum("bqk,bkd->bqd", a, v,
                                preferred_element_type=jnp.float32))
    ctx = jnp.concatenate(heads, axis=-1).reshape(TB * J, D)
    attn_out = jnp.dot(ctx, wo_ref[...], preferred_element_type=jnp.float32) + bo_ref[...]
    x1 = x2 + attn_out                                              # residual (dropout = id)

    # ---------------- sublayer 1: position-wise feed-forward ----------------
    xn1 = layernorm(x1, ln2_a_ref, ln2_b_ref)
    hid = jnp.maximum(
        jnp.dot(xn1, wf1_ref[...], preferred_element_type=jnp.float32) + bf1_ref[...], 0.0)
    ffn = jnp.dot(hid, wf2_ref[...], preferred_element_type=jnp.float32) + bf2_ref[...]
    out = x1 + ffn                                                  # residual (dropout = id)

    o_ref[...] = out.reshape(TB, J, D).astype(o_ref.dtype)


# ----------------------------------------------------------------------------- wrapper

def _pick_tb(batch):
    # prefer >= 2 grid steps (v7x has 2 TCs) while batching as many examples per
    # step as possible to fill the MXU M-dim and amortize per-step overhead.
    for tb in (8, 4, 2, 1):
        if batch % tb == 0 and batch // tb >= 2:
            return tb
    return 1 if batch % 1 else 1


def gra_atten_layer(x, mask, p, *, num_heads=4, eps=1e-6):
    B, J, D = x.shape
    assert D % num_heads == 0
    Dff = p["wf1"].shape[1]
    TB = _pick_tb(B)
    assert B % TB == 0
    grid = (B // TB,)

    kern = functools.partial(_gra_atten_kernel, num_heads=num_heads, eps=eps)

    def full(shape):
        return pl.BlockSpec(shape, lambda b, _n=len(shape): (0,) * _n)

    in_specs = [
        pl.BlockSpec((TB, J, D), lambda b: (b, 0, 0)),   # x, TB batch elems per step
        full((J, J)),                                    # mask
        full((1, D)), full((1, D)),                      # LayerNorm 1 a_2 / b_2
        full((D, 3 * D)), full((1, 3 * D)),              # fused W_qkv, b_qkv
        full((D, D)), full((1, D)),                      # W_o, b_o
        full((1, D)), full((1, D)),                      # LayerNorm 2 a_2 / b_2
        full((D, Dff)), full((1, Dff)),                  # FFN W1, b1
        full((Dff, D)), full((1, D)),                    # FFN W2, b2
    ]

    return pl.pallas_call(
        kern,
        out_shape=jax.ShapeDtypeStruct((B, J, D), x.dtype),
        grid_spec=pltpu.PrefetchScalarGridSpec(
            num_scalar_prefetch=0,
            grid=grid,
            in_specs=in_specs,
            out_specs=pl.BlockSpec((TB, J, D), lambda b: (b, 0, 0)),
        ),
        compiler_params=pltpu.CompilerParams(dimension_semantics=("parallel",)),
    )(x, mask,
      p["ln1_a"], p["ln1_b"],
      p["wqkv"], p["bqkv"], p["wo"], p["bo"],
      p["ln2_a"], p["ln2_b"],
      p["wf1"], p["bf1"], p["wf2"], p["bf2"])


# ------------------------------------------------------------------- params & reference

def init_params(key, D, H, Dff):
    ks = jax.random.split(key, 8)

    def lin(k, cin, cout):
        k1, k2 = jax.random.split(k)
        bound = 1.0 / math.sqrt(cin)
        w = jax.random.uniform(k1, (cin, cout), minval=-bound, maxval=bound, dtype=jnp.float32)
        b = jax.random.uniform(k2, (1, cout), minval=-bound, maxval=bound, dtype=jnp.float32)
        return w, b

    wq, bq = lin(ks[0], D, D)
    wk, bk = lin(ks[1], D, D)
    wv, bv = lin(ks[2], D, D)
    wqkv = jnp.concatenate([wq, wk, wv], axis=1)      # (D, 3D) fused QKV projection
    bqkv = jnp.concatenate([bq, bk, bv], axis=1)
    wo, bo = lin(ks[3], D, D)
    wf1, bf1 = lin(ks[4], D, Dff)
    wf2, bf2 = lin(ks[5], Dff, D)

    k6a, k6b = jax.random.split(ks[6])
    k7a, k7b = jax.random.split(ks[7])
    ln1_a = 1.0 + 0.1 * jax.random.normal(k6a, (1, D), dtype=jnp.float32)
    ln1_b = 0.1 * jax.random.normal(k6b, (1, D), dtype=jnp.float32)
    ln2_a = 1.0 + 0.1 * jax.random.normal(k7a, (1, D), dtype=jnp.float32)
    ln2_b = 0.1 * jax.random.normal(k7b, (1, D), dtype=jnp.float32)

    return dict(wqkv=wqkv, bqkv=bqkv, wo=wo, bo=bo,
                wf1=wf1, bf1=bf1, wf2=wf2, bf2=bf2,
                ln1_a=ln1_a, ln1_b=ln1_b, ln2_a=ln2_a, ln2_b=ln2_b)


def ref_forward(x, mask, p, *, num_heads=4, eps=1e-6):
    B, J, D = x.shape
    dk = D // num_heads

    def layernorm(h, a, b):
        mean = jnp.mean(h, axis=-1, keepdims=True)
        hc = h - mean
        std = jnp.sqrt(jnp.sum(hc * hc, axis=-1, keepdims=True) / (D - 1))
        return a * hc / (std + eps) + b

    # sublayer 0: self-attention
    xn = layernorm(x, p["ln1_a"][0], p["ln1_b"][0])
    qkv = jnp.einsum("bjd,de->bje", xn, p["wqkv"]) + p["bqkv"][0]
    q, k, v = jnp.split(qkv, 3, axis=-1)
    q = q.reshape(B, J, num_heads, dk).transpose(0, 2, 1, 3)
    k = k.reshape(B, J, num_heads, dk).transpose(0, 2, 1, 3)
    v = v.reshape(B, J, num_heads, dk).transpose(0, 2, 1, 3)
    s = jnp.einsum("bhqd,bhkd->bhqk", q, k) / math.sqrt(dk)
    s = jnp.where(mask[None, None] > 0, s, jnp.float32(-1e9))
    s_max = jnp.max(s, axis=-1, keepdims=True)
    e = jnp.exp(s - s_max)
    a = e / jnp.sum(e, axis=-1, keepdims=True)
    ctx = jnp.einsum("bhqk,bhkd->bhqd", a, v).transpose(0, 2, 1, 3).reshape(B, J, D)
    attn_out = jnp.einsum("bjd,de->bje", ctx, p["wo"]) + p["bo"][0]
    x1 = x + attn_out

    # sublayer 1: feed-forward
    xn1 = layernorm(x1, p["ln2_a"][0], p["ln2_b"][0])
    h = jnp.maximum(jnp.einsum("bjd,df->bjf", xn1, p["wf1"]) + p["bf1"][0], 0.0)
    ffn = jnp.einsum("bjf,fd->bjd", h, p["wf2"]) + p["bf2"][0]
    return x1 + ffn


# ----------------------------------------------------------------------------- main

if __name__ == "__main__":
    jax.config.update("jax_default_matmul_precision", "highest")

    B, J, D, H, Dff = 2, 16, 32, 4, 64
    key = jax.random.PRNGKey(0)
    kx, kp = jax.random.split(key)

    x = jax.random.normal(kx, (B, J, D), dtype=jnp.float32)
    params = init_params(kp, D, H, Dff)
    # graph-style attention mask: allow |i-j| <= 3 (1.0 = attend, 0.0 = masked out)
    idx = jnp.arange(J)
    mask = (jnp.abs(idx[:, None] - idx[None, :]) <= 3).astype(jnp.float32)

    out = gra_atten_layer(x, mask, params, num_heads=H)
    out = jax.block_until_ready(out)

    ref = ref_forward(x, mask, params, num_heads=H)
    assert out.shape == (B, J, D), out.shape
    err = float(jnp.max(jnp.abs(out - ref)))
    assert jnp.allclose(out, ref, atol=1e-4, rtol=1e-4), err
    print("KERNEL_OK")
</pallas_src>

<mosaic_0001>
module attributes {stable_mosaic.version = 11 : i64} {
  func.func @_gra_atten_kernel(%arg0: i32, %arg1: memref<1x16x32xf32, #tpu.memory_space<vmem>>, %arg2: memref<16x16xf32, #tpu.memory_space<vmem>>, %arg3: memref<1x32xf32, #tpu.memory_space<vmem>>, %arg4: memref<1x32xf32, #tpu.memory_space<vmem>>, %arg5: memref<32x96xf32, #tpu.memory_space<vmem>>, %arg6: memref<1x96xf32, #tpu.memory_space<vmem>>, %arg7: memref<32x32xf32, #tpu.memory_space<vmem>>, %arg8: memref<1x32xf32, #tpu.memory_space<vmem>>, %arg9: memref<1x32xf32, #tpu.memory_space<vmem>>, %arg10: memref<1x32xf32, #tpu.memory_space<vmem>>, %arg11: memref<32x64xf32, #tpu.memory_space<vmem>>, %arg12: memref<1x64xf32, #tpu.memory_space<vmem>>, %arg13: memref<64x32xf32, #tpu.memory_space<vmem>>, %arg14: memref<1x32xf32, #tpu.memory_space<vmem>>, %arg15: memref<1x16x32xf32, #tpu.memory_space<vmem>>) attributes {dimension_semantics = [#tpu.dimension_semantics<parallel>], iteration_bounds = array<i64: 2>, scalar_prefetch = 0 : i64, scratch_operands = 0 : i64, tpu.core_type = #tpu.core_type<tc>, window_params = [{transform_indices = @transform_0, window_bounds = array<i64: 1, 16, 32>}, {pipeline_mode = #tpu.pipeline_mode<synchronous>, transform_indices = @transform_1, window_bounds = array<i64: 16, 16>}, {pipeline_mode = #tpu.pipeline_mode<synchronous>, transform_indices = @transform_2, window_bounds = array<i64: 1, 32>}, {pipeline_mode = #tpu.pipeline_mode<synchronous>, transform_indices = @transform_3, window_bounds = array<i64: 1, 32>}, {pipeline_mode = #tpu.pipeline_mode<synchronous>, transform_indices = @transform_4, window_bounds = array<i64: 32, 96>}, {pipeline_mode = #tpu.pipeline_mode<synchronous>, transform_indices = @transform_5, window_bounds = array<i64: 1, 96>}, {pipeline_mode = #tpu.pipeline_mode<synchronous>, transform_indices = @transform_6, window_bounds = array<i64: 32, 32>}, {pipeline_mode = #tpu.pipeline_mode<synchronous>, transform_indices = @transform_7, window_bounds = array<i64: 1, 32>}, {pipeline_mode = #tpu.pipeline_mode<synchronous>, transform_indices = @transform_8, window_bounds = array<i64: 1, 32>}, {pipeline_mode = #tpu.pipeline_mode<synchronous>, transform_indices = @transform_9, window_bounds = array<i64: 1, 32>}, {pipeline_mode = #tpu.pipeline_mode<synchronous>, transform_indices = @transform_10, window_bounds = array<i64: 32, 64>}, {pipeline_mode = #tpu.pipeline_mode<synchronous>, transform_indices = @transform_11, window_bounds = array<i64: 1, 64>}, {pipeline_mode = #tpu.pipeline_mode<synchronous>, transform_indices = @transform_12, window_bounds = array<i64: 64, 32>}, {pipeline_mode = #tpu.pipeline_mode<synchronous>, transform_indices = @transform_13, window_bounds = array<i64: 1, 32>}, {transform_indices = @transform_14, window_bounds = array<i64: 1, 16, 32>}]} {
    %c0 = arith.constant 0 : index
    %c0_0 = arith.constant 0 : index
    %c0_1 = arith.constant 0 : index
    %0 = vector.load %arg1[%c0, %c0_0, %c0_1] : memref<1x16x32xf32, #tpu.memory_space<vmem>>, vector<1x16x32xf32>
    %1 = vector.shape_cast %0 : vector<1x16x32xf32> to vector<16x32xf32>
    %cst = arith.constant dense<0.000000e+00> : vector<16xf32>
    %2 = vector.multi_reduction <add>, %1, %cst [1] : vector<16x32xf32> to vector<16xf32>
    %3 = vector.shape_cast %2 : vector<16xf32> to vector<16x1xf32>
    %cst_2 = arith.constant 3.200000e+01 : f32
    %4 = vector.broadcast %cst_2 : f32 to vector<16x1xf32>
    %5 = arith.divf %3, %4 : vector<16x1xf32>
    %6 = vector.broadcast %5 : vector<16x1xf32> to vector<16x32xf32>
    %7 = arith.subf %1, %6 : vector<16x32xf32>
    %8 = arith.mulf %7, %7 : vector<16x32xf32>
    %cst_3 = arith.constant dense<0.000000e+00> : vector<16xf32>
    %9 = vector.multi_reduction <add>, %8, %cst_3 [1] : vector<16x32xf32> to vector<16xf32>
    %10 = vector.shape_cast %9 : vector<16xf32> to vector<16x1xf32>
    %cst_4 = arith.constant 3.100000e+01 : f32
    %11 = vector.broadcast %cst_4 : f32 to vector<16x1xf32>
    %12 = arith.divf %10, %11 : vector<16x1xf32>
    %c0_5 = arith.constant 0 : index
    %c0_6 = arith.constant 0 : index
    %13 = vector.load %arg3[%c0_5, %c0_6] : memref<1x32xf32, #tpu.memory_space<vmem>>, vector<1x32xf32>
    %14 = vector.broadcast %13 : vector<1x32xf32> to vector<16x32xf32>
    %15 = arith.mulf %14, %7 : vector<16x32xf32>
    %16 = math.sqrt %12 : vector<16x1xf32>
    %cst_7 = arith.constant 9.99999997E-7 : f32
    %17 = vector.broadcast %cst_7 : f32 to vector<16x1xf32>
    %18 = arith.addf %16, %17 : vector<16x1xf32>
    %19 = vector.broadcast %18 : vector<16x1xf32> to vector<16x32xf32>
    %20 = arith.divf %15, %19 : vector<16x32xf32>
    %c0_8 = arith.constant 0 : index
    %c0_9 = arith.constant 0 : index
    %21 = vector.load %arg4[%c0_8, %c0_9] : memref<1x32xf32, #tpu.memory_space<vmem>>, vector<1x32xf32>
    %22 = vector.broadcast %21 : vector<1x32xf32> to vector<16x32xf32>
    %23 = arith.addf %20, %22 : vector<16x32xf32>
    %c0_10 = arith.constant 0 : index
    %c0_11 = arith.constant 0 : index
    %24 = vector.load %arg5[%c0_10, %c0_11] : memref<32x96xf32, #tpu.memory_space<vmem>>, vector<32x96xf32>
    %cst_12 = arith.constant dense<0.000000e+00> : vector<16x96xf32>
    %25 = tpu.matmul %23, %24, %cst_12 {dimension_numbers = #tpu.dot_dimension_numbers<[1], [0], [0], [1], [0, 0, 1, 1], [], []>, precision = #tpu.contract_precision<fp32>} : vector<16x32xf32>, vector<32x96xf32>, vector<16x96xf32> -> vector<16x96xf32>
    %c0_13 = arith.constant 0 : index
    %c0_14 = arith.constant 0 : index
    %26 = vector.load %arg6[%c0_13, %c0_14] : memref<1x96xf32, #tpu.memory_space<vmem>>, vector<1x96xf32>
    %27 = vector.broadcast %26 : vector<1x96xf32> to vector<16x96xf32>
    %28 = arith.addf %25, %27 : vector<16x96xf32>
    %c0_15 = arith.constant 0 : index
    %c0_16 = arith.constant 0 : index
    %29 = vector.load %arg2[%c0_15, %c0_16] : memref<16x16xf32, #tpu.memory_space<vmem>>, vector<16x16xf32>
    %30 = vector.shape_cast %29 : vector<16x16xf32> to vector<1x16x16xf32>
    %cst_17 = arith.constant 0.000000e+00 : f32
    %31 = vector.broadcast %cst_17 : f32 to vector<1x16x16xf32>
    %32 = arith.cmpf ogt, %30, %31 : vector<1x16x16xf32>
    %33 = vector.extract_strided_slice %28 {offsets = [0, 0], sizes = [16, 8], strides = [1, 1]} : vector<16x96xf32> to vector<16x8xf32>
    %34 = vector.shape_cast %33 : vector<16x8xf32> to vector<1x16x8xf32>
    %35 = vector.extract_strided_slice %28 {offsets = [0, 32], sizes = [16, 8], strides = [1, 1]} : vector<16x96xf32> to vector<16x8xf32>
    %36 = vector.shape_cast %35 : vector<16x8xf32> to vector<1x16x8xf32>
    %37 = vector.extract_strided_slice %28 {offsets = [0, 64], sizes = [16, 8], strides = [1, 1]} : vector<16x96xf32> to vector<16x8xf32>
    %38 = vector.shape_cast %37 : vector<16x8xf32> to vector<1x16x8xf32>
    "tpu.trace_start"() <{level = 10 : i32, message = "bqd,bkd->bqk"}> : () -> ()
    %cst_18 = arith.constant dense<0.000000e+00> : vector<1x16x16xf32>
    %39 = tpu.matmul %34, %36, %cst_18 {dimension_numbers = #tpu.dot_dimension_numbers<[2], [2], [1], [1], [0, 0, 0, 1, 1, 1], [0], [0]>, precision = #tpu.contract_precision<fp32>} : vector<1x16x8xf32>, vector<1x16x8xf32>, vector<1x16x16xf32> -> vector<1x16x16xf32>
    "tpu.trace_stop"() : () -> ()
    %cst_19 = arith.constant 0.353553385 : f32
    %40 = vector.broadcast %cst_19 : f32 to vector<1x16x16xf32>
    %41 = arith.mulf %39, %40 : vector<1x16x16xf32>
    %cst_20 = arith.constant -1.000000e+09 : f32
    %42 = vector.broadcast %cst_20 : f32 to vector<1x16x16xf32>
    %43 = arith.select %32, %41, %42 : vector<1x16x16xi1>, vector<1x16x16xf32>
    %cst_21 = arith.constant dense<0xFF800000> : vector<1x16xf32>
    %44 = vector.multi_reduction <maximumf>, %43, %cst_21 [2] : vector<1x16x16xf32> to vector<1x16xf32>
    %45 = vector.shape_cast %44 : vector<1x16xf32> to vector<1x16x1xf32>
    %46 = vector.broadcast %45 : vector<1x16x1xf32> to vector<1x16x16xf32>
    %47 = arith.subf %43, %46 : vector<1x16x16xf32>
    %48 = math.exp %47 : vector<1x16x16xf32>
    %cst_22 = arith.constant dense<0.000000e+00> : vector<1x16xf32>
    %49 = vector.multi_reduction <add>, %48, %cst_22 [2] : vector<1x16x16xf32> to vector<1x16xf32>
    %50 = vector.shape_cast %49 : vector<1x16xf32> to vector<1x16x1xf32>
    %51 = vector.broadcast %50 : vector<1x16x1xf32> to vector<1x16x16xf32>
    %52 = arith.divf %48, %51 : vector<1x16x16xf32>
    "tpu.trace_start"() <{level = 10 : i32, message = "bqk,bkd->bqd"}> : () -> ()
    %cst_23 = arith.constant dense<0.000000e+00> : vector<1x16x8xf32>
    %53 = tpu.matmul %52, %38, %cst_23 {dimension_numbers = #tpu.dot_dimension_numbers<[2], [1], [1], [2], [0, 0, 0, 1, 1, 2], [0], [0]>, precision = #tpu.contract_precision<fp32>} : vector<1x16x16xf32>, vector<1x16x8xf32>, vector<1x16x8xf32> -> vector<1x16x8xf32>
    "tpu.trace_stop"() : () -> ()
    %54 = vector.extract_strided_slice %28 {offsets = [0, 8], sizes = [16, 8], strides = [1, 1]} : vector<16x96xf32> to vector<16x8xf32>
    %55 = vector.shape_cast %54 : vector<16x8xf32> to vector<1x16x8xf32>
    %56 = vector.extract_strided_slice %28 {offsets = [0, 40], sizes = [16, 8], strides = [1, 1]} : vector<16x96xf32> to vector<16x8xf32>
    %57 = vector.shape_cast %56 : vector<16x8xf32> to vector<1x16x8xf32>
    %58 = vector.extract_strided_slice %28 {offsets = [0, 72], sizes = [16, 8], strides = [1, 1]} : vector<16x96xf32> to vector<16x8xf32>
    %59 = vector.shape_cast %58 : vector<16x8xf32> to vector<1x16x8xf32>
    "tpu.trace_start"() <{level = 10 : i32, message = "bqd,bkd->bqk"}> : () -> ()
    %cst_24 = arith.constant dense<0.000000e+00> : vector<1x16x16xf32>
    %60 = tpu.matmul %55, %57, %cst_24 {dimension_numbers = #tpu.dot_dimension_numbers<[2], [2], [1], [1], [0, 0, 0, 1, 1, 1], [0], [0]>, precision = #tpu.contract_precision<fp32>} : vector<1x16x8xf32>, vector<1x16x8xf32>, vector<1x16x16xf32> -> vector<1x16x16xf32>
    "tpu.trace_stop"() : () -> ()
    %cst_25 = arith.constant 0.353553385 : f32
    %61 = vector.broadcast %cst_25 : f32 to vector<1x16x16xf32>
    %62 = arith.mulf %60, %61 : vector<1x16x16xf32>
    %cst_26 = arith.constant -1.000000e+09 : f32
    %63 = vector.broadcast %cst_26 : f32 to vector<1x16x16xf32>
    %64 = arith.select %32, %62, %63 : vector<1x16x16xi1>, vector<1x16x16xf32>
    %cst_27 = arith.constant dense<0xFF800000> : vector<1x16xf32>
    %65 = vector.multi_reduction <maximumf>, %64, %cst_27 [2] : vector<1x16x16xf32> to vector<1x16xf32>
    %66 = vector.shape_cast %65 : vector<1x16xf32> to vector<1x16x1xf32>
    %67 = vector.broadcast %66 : vector<1x16x1xf32> to vector<1x16x16xf32>
    %68 = arith.subf %64, %67 : vector<1x16x16xf32>
    %69 = math.exp %68 : vector<1x16x16xf32>
    %cst_28 = arith.constant dense<0.000000e+00> : vector<1x16xf32>
    %70 = vector.multi_reduction <add>, %69, %cst_28 [2] : vector<1x16x16xf32> to vector<1x16xf32>
    %71 = vector.shape_cast %70 : vector<1x16xf32> to vector<1x16x1xf32>
    %72 = vector.broadcast %71 : vector<1x16x1xf32> to vector<1x16x16xf32>
    %73 = arith.divf %69, %72 : vector<1x16x16xf32>
    "tpu.trace_start"() <{level = 10 : i32, message = "bqk,bkd->bqd"}> : () -> ()
    %cst_29 = arith.constant dense<0.000000e+00> : vector<1x16x8xf32>
    %74 = tpu.matmul %73, %59, %cst_29 {dimension_numbers = #tpu.dot_dimension_numbers<[2], [1], [1], [2], [0, 0, 0, 1, 1, 2], [0], [0]>, precision = #tpu.contract_precision<fp32>} : vector<1x16x16xf32>, vector<1x16x8xf32>, vector<1x16x8xf32> -> vector<1x16x8xf32>
    "tpu.trace_stop"() : () -> ()
    %75 = vector.extract_strided_slice %28 {offsets = [0, 16], sizes = [16, 8], strides = [1, 1]} : vector<16x96xf32> to vector<16x8xf32>
    %76 = vector.shape_cast %75 : vector<16x8xf32> to vector<1x16x8xf32>
    %77 = vector.extract_strided_slice %28 {offsets = [0, 48], sizes = [16, 8], strides = [1, 1]} : vector<16x96xf32> to vector<16x8xf32>
    %78 = vector.shape_cast %77 : vector<16x8xf32> to vector<1x16x8xf32>
    %79 = vector.extract_strided_slice %28 {offsets = [0, 80], sizes = [16, 8], strides = [1, 1]} : vector<16x96xf32> to vector<16x8xf32>
    %80 = vector.shape_cast %79 : vector<16x8xf32> to vector<1x16x8xf32>
    "tpu.trace_start"() <{level = 10 : i32, message = "bqd,bkd->bqk"}> : () -> ()
    %cst_30 = arith.constant dense<0.000000e+00> : vector<1x16x16xf32>
    %81 = tpu.matmul %76, %78, %cst_30 {dimension_numbers = #tpu.dot_dimension_numbers<[2], [2], [1], [1], [0, 0, 0, 1, 1, 1], [0], [0]>, precision = #tpu.contract_precision<fp32>} : vector<1x16x8xf32>, vector<1x16x8xf32>, vector<1x16x16xf32> -> vector<1x16x16xf32>
    "tpu.trace_stop"() : () -> ()
    %cst_31 = arith.constant 0.353553385 : f32
    %82 = vector.broadcast %cst_31 : f32 to vector<1x16x16xf32>
    %83 = arith.mulf %81, %82 : vector<1x16x16xf32>
    %cst_32 = arith.constant -1.000000e+09 : f32
    %84 = vector.broadcast %cst_32 : f32 to vector<1x16x16xf32>
    %85 = arith.select %32, %83, %84 : vector<1x16x16xi1>, vector<1x16x16xf32>
    %cst_33 = arith.constant dense<0xFF800000> : vector<1x16xf32>
    %86 = vector.multi_reduction <maximumf>, %85, %cst_33 [2] : vector<1x16x16xf32> to vector<1x16xf32>
    %87 = vector.shape_cast %86 : vector<1x16xf32> to vector<1x16x1xf32>
    %88 = vector.broadcast %87 : vector<1x16x1xf32> to vector<1x16x16xf32>
    %89 = arith.subf %85, %88 : vector<1x16x16xf32>
    %90 = math.exp %89 : vector<1x16x16xf32>
    %cst_34 = arith.constant dense<0.000000e+00> : vector<1x16xf32>
    %91 = vector.multi_reduction <add>, %90, %cst_34 [2] : vector<1x16x16xf32> to vector<1x16xf32>
    %92 = vector.shape_cast %91 : vector<1x16xf32> to vector<1x16x1xf32>
    %93 = vector.broadcast %92 : vector<1x16x1xf32> to vector<1x16x16xf32>
    %94 = arith.divf %90, %93 : vector<1x16x16xf32>
    "tpu.trace_start"() <{level = 10 : i32, message = "bqk,bkd->bqd"}> : () -> ()
    %cst_35 = arith.constant dense<0.000000e+00> : vector<1x16x8xf32>
    %95 = tpu.matmul %94, %80, %cst_35 {dimension_numbers = #tpu.dot_dimension_numbers<[2], [1], [1], [2], [0, 0, 0, 1, 1, 2], [0], [0]>, precision = #tpu.contract_precision<fp32>} : vector<1x16x16xf32>, vector<1x16x8xf32>, vector<1x16x8xf32> -> vector<1x16x8xf32>
    "tpu.trace_stop"() : () -> ()
    %96 = vector.extract_strided_slice %28 {offsets = [0, 24], sizes = [16, 8], strides = [1, 1]} : vector<16x96xf32> to vector<16x8xf32>
    %97 = vector.shape_cast %96 : vector<16x8xf32> to vector<1x16x8xf32>
    %98 = vector.extract_strided_slice %28 {offsets = [0, 56], sizes = [16, 8], strides = [1, 1]} : vector<16x96xf32> to vector<16x8xf32>
    %99 = vector.shape_cast %98 : vector<16x8xf32> to vector<1x16x8xf32>
    %100 = vector.extract_strided_slice %28 {offsets = [0, 88], sizes = [16, 8], strides = [1, 1]} : vector<16x96xf32> to vector<16x8xf32>
    %101 = vector.shape_cast %100 : vector<16x8xf32> to vector<1x16x8xf32>
    "tpu.trace_start"() <{level = 10 : i32, message = "bqd,bkd->bqk"}> : () -> ()
    %cst_36 = arith.constant dense<0.000000e+00> : vector<1x16x16xf32>
    %102 = tpu.matmul %97, %99, %cst_36 {dimension_numbers = #tpu.dot_dimension_numbers<[2], [2], [1], [1], [0, 0, 0, 1, 1, 1], [0], [0]>, precision = #tpu.contract_precision<fp32>} : vector<1x16x8xf32>, vector<1x16x8xf32>, vector<1x16x16xf32> -> vector<1x16x16xf32>
    "tpu.trace_stop"() : () -> ()
    %cst_37 = arith.constant 0.353553385 : f32
    %103 = vector.broadcast %cst_37 : f32 to vector<1x16x16xf32>
    %104 = arith.mulf %102, %103 : vector<1x16x16xf32>
    %cst_38 = arith.constant -1.000000e+09 : f32
    %105 = vector.broadcast %cst_38 : f32 to vector<1x16x16xf32>
    %106 = arith.select %32, %104, %105 : vector<1x16x16xi1>, vector<1x16x16xf32>
    %cst_39 = arith.constant dense<0xFF800000> : vector<1x16xf32>
    %107 = vector.multi_reduction <maximumf>, %106, %cst_39 [2] : vector<1x16x16xf32> to vector<1x16xf32>
    %108 = vector.shape_cast %107 : vector<1x16xf32> to vector<1x16x1xf32>
    %109 = vector.broadcast %108 : vector<1x16x1xf32> to vector<1x16x16xf32>
    %110 = arith.subf %106, %109 : vector<1x16x16xf32>
    %111 = math.exp %110 : vector<1x16x16xf32>
    %cst_40 = arith.constant dense<0.000000e+00> : vector<1x16xf32>
    %112 = vector.multi_reduction <add>, %111, %cst_40 [2] : vector<1x16x16xf32> to vector<1x16xf32>
    %113 = vector.shape_cast %112 : vector<1x16xf32> to vector<1x16x1xf32>
    %114 = vector.broadcast %113 : vector<1x16x1xf32> to vector<1x16x16xf32>
    %115 = arith.divf %111, %114 : vector<1x16x16xf32>
    "tpu.trace_start"() <{level = 10 : i32, message = "bqk,bkd->bqd"}> : () -> ()
    %cst_41 = arith.constant dense<0.000000e+00> : vector<1x16x8xf32>
    %116 = tpu.matmul %115, %101, %cst_41 {dimension_numbers = #tpu.dot_dimension_numbers<[2], [1], [1], [2], [0, 0, 0, 1, 1, 2], [0], [0]>, precision = #tpu.contract_precision<fp32>} : vector<1x16x16xf32>, vector<1x16x8xf32>, vector<1x16x8xf32> -> vector<1x16x8xf32>
    "tpu.trace_stop"() : () -> ()
    %117 = tpu.concatenate %53, %74, %95, %116 in 2 : vector<1x16x8xf32>, vector<1x16x8xf32>, vector<1x16x8xf32>, vector<1x16x8xf32> -> vector<1x16x32xf32>
    %118 = vector.shape_cast %117 : vector<1x16x32xf32> to vector<16x32xf32>
    %c0_42 = arith.constant 0 : index
    %c0_43 = arith.constant 0 : index
    %119 = vector.load %arg7[%c0_42, %c0_43] : memref<32x32xf32, #tpu.memory_space<vmem>>, vector<32x32xf32>
    %cst_44 = arith.constant dense<0.000000e+00> : vector<16x32xf32>
    %120 = tpu.matmul %118, %119, %cst_44 {dimension_numbers = #tpu.dot_dimension_numbers<[1], [0], [0], [1], [0, 0, 1, 1], [], []>, precision = #tpu.contract_precision<fp32>} : vector<16x32xf32>, vector<32x32xf32>, vector<16x32xf32> -> vector<16x32xf32>
    %c0_45 = arith.constant 0 : index
    %c0_46 = arith.constant 0 : index
    %121 = vector.load %arg8[%c0_45, %c0_46] : memref<1x32xf32, #tpu.memory_space<vmem>>, vector<1x32xf32>
    %122 = vector.broadcast %121 : vector<1x32xf32> to vector<16x32xf32>
    %123 = arith.addf %120, %122 : vector<16x32xf32>
    %124 = arith.addf %1, %123 : vector<16x32xf32>
    %cst_47 = arith.constant dense<0.000000e+00> : vector<16xf32>
    %125 = vector.multi_reduction <add>, %124, %cst_47 [1] : vector<16x32xf32> to vector<16xf32>
    %126 = vector.shape_cast %125 : vector<16xf32> to vector<16x1xf32>
    %cst_48 = arith.constant 3.200000e+01 : f32
    %127 = vector.broadcast %cst_48 : f32 to vector<16x1xf32>
    %128 = arith.divf %126, %127 : vector<16x1xf32>
    %129 = vector.broadcast %128 : vector<16x1xf32> to vector<16x32xf32>
    %130 = arith.subf %124, %129 : vector<16x32xf32>
    %131 = arith.mulf %130, %130 : vector<16x32xf32>
    %cst_49 = arith.constant dense<0.000000e+00> : vector<16xf32>
    %132 = vector.multi_reduction <add>, %131, %cst_49 [1] : vector<16x32xf32> to vector<16xf32>
    %133 = vector.shape_cast %132 : vector<16xf32> to vector<16x1xf32>
    %cst_50 = arith.constant 3.100000e+01 : f32
    %134 = vector.broadcast %cst_50 : f32 to vector<16x1xf32>
    %135 = arith.divf %133, %134 : vector<16x1xf32>
    %c0_51 = arith.constant 0 : index
    %c0_52 = arith.constant 0 : index
    %136 = vector.load %arg9[%c0_51, %c0_52] : memref<1x32xf32, #tpu.memory_space<vmem>>, vector<1x32xf32>
    %137 = vector.broadcast %136 : vector<1x32xf32> to vector<16x32xf32>
    %138 = arith.mulf %137, %130 : vector<16x32xf32>
    %139 = math.sqrt %135 : vector<16x1xf32>
    %cst_53 = arith.constant 9.99999997E-7 : f32
    %140 = vector.broadcast %cst_53 : f32 to vector<16x1xf32>
    %141 = arith.addf %139, %140 : vector<16x1xf32>
    %142 = vector.broadcast %141 : vector<16x1xf32> to vector<16x32xf32>
    %143 = arith.divf %138, %142 : vector<16x32xf32>
    %c0_54 = arith.constant 0 : index
    %c0_55 = arith.constant 0 : index
    %144 = vector.load %arg10[%c0_54, %c0_55] : memref<1x32xf32, #tpu.memory_space<vmem>>, vector<1x32xf32>
    %145 = vector.broadcast %144 : vector<1x32xf32> to vector<16x32xf32>
    %146 = arith.addf %143, %145 : vector<16x32xf32>
    %c0_56 = arith.constant 0 : index
    %c0_57 = arith.constant 0 : index
    %147 = vector.load %arg11[%c0_56, %c0_57] : memref<32x64xf32, #tpu.memory_space<vmem>>, vector<32x64xf32>
    %cst_58 = arith.constant dense<0.000000e+00> : vector<16x64xf32>
    %148 = tpu.matmul %146, %147, %cst_58 {dimension_numbers = #tpu.dot_dimension_numbers<[1], [0], [0], [1], [0, 0, 1, 1], [], []>, precision = #tpu.contract_precision<fp32>} : vector<16x32xf32>, vector<32x64xf32>, vector<16x64xf32> -> vector<16x64xf32>
    %c0_59 = arith.constant 0 : index
    %c0_60 = arith.constant 0 : index
    %149 = vector.load %arg12[%c0_59, %c0_60] : memref<1x64xf32, #tpu.memory_space<vmem>>, vector<1x64xf32>
    %150 = vector.broadcast %149 : vector<1x64xf32> to vector<16x64xf32>
    %151 = arith.addf %148, %150 : vector<16x64xf32>
    %cst_61 = arith.constant 0.000000e+00 : f32
    %152 = vector.broadcast %cst_61 : f32 to vector<16x64xf32>
    %153 = arith.maximumf %151, %152 : vector<16x64xf32>
    %c0_62 = arith.constant 0 : index
    %c0_63 = arith.constant 0 : index
    %154 = vector.load %arg13[%c0_62, %c0_63] : memref<64x32xf32, #tpu.memory_space<vmem>>, vector<64x32xf32>
    %cst_64 = arith.constant dense<0.000000e+00> : vector<16x32xf32>
    %155 = tpu.matmul %153, %154, %cst_64 {dimension_numbers = #tpu.dot_dimension_numbers<[1], [0], [0], [1], [0, 0, 1, 1], [], []>, precision = #tpu.contract_precision<fp32>} : vector<16x64xf32>, vector<64x32xf32>, vector<16x32xf32> -> vector<16x32xf32>
    %c0_65 = arith.constant 0 : index
    %c0_66 = arith.constant 0 : index
    %156 = vector.load %arg14[%c0_65, %c0_66] : memref<1x32xf32, #tpu.memory_space<vmem>>, vector<1x32xf32>
    %157 = vector.broadcast %156 : vector<1x32xf32> to vector<16x32xf32>
    %158 = arith.addf %155, %157 : vector<16x32xf32>
    %159 = arith.addf %124, %158 : vector<16x32xf32>
    %160 = vector.shape_cast %159 : vector<16x32xf32> to vector<1x16x32xf32>
    %c0_67 = arith.constant 0 : index
    %c0_68 = arith.constant 0 : index
    %c0_69 = arith.constant 0 : index
    %161 = vector.load %arg15[%c0_67, %c0_68, %c0_69] : memref<1x16x32xf32, #tpu.memory_space<vmem>>, vector<1x16x32xf32>
    tpu.vector_store %arg15[%c0_67, %c0_68, %c0_69], %160 {strides = array<i32>} : memref<1x16x32xf32, #tpu.memory_space<vmem>>, vector<1x16x32xf32>,
    return
  }
  func.func @transform_0(%arg0: i32) -> (i32, i32, i32) {
    %c0_i32 = arith.constant 0 : i32
    %c0_i32_0 = arith.constant 0 : i32
    %c0_i32_1 = arith.constant 0 : i32
    return %arg0, %c0_i32, %c0_i32_0 : i32, i32, i32
  }
  func.func @transform_1(%arg0: i32) -> (i32, i32) {
    %c0_i32 = arith.constant 0 : i32
    %c0_i32_0 = arith.constant 0 : i32
    %c0_i32_1 = arith.constant 0 : i32
    return %c0_i32, %c0_i32_0 : i32, i32
  }
  func.func @transform_2(%arg0: i32) -> (i32, i32) {
    %c0_i32 = arith.constant 0 : i32
    %c0_i32_0 = arith.constant 0 : i32
    %c0_i32_1 = arith.constant 0 : i32
    return %c0_i32, %c0_i32_0 : i32, i32
  }
  func.func @transform_3(%arg0: i32) -> (i32, i32) {
    %c0_i32 = arith.constant 0 : i32
    %c0_i32_0 = arith.constant 0 : i32
    %c0_i32_1 = arith.constant 0 : i32
    return %c0_i32, %c0_i32_0 : i32, i32
  }
  func.func @transform_4(%arg0: i32) -> (i32, i32) {
    %c0_i32 = arith.constant 0 : i32
    %c0_i32_0 = arith.constant 0 : i32
    %c0_i32_1 = arith.constant 0 : i32
    return %c0_i32, %c0_i32_0 : i32, i32
  }
  func.func @transform_5(%arg0: i32) -> (i32, i32) {
    %c0_i32 = arith.constant 0 : i32
    %c0_i32_0 = arith.constant 0 : i32
    %c0_i32_1 = arith.constant 0 : i32
    return %c0_i32, %c0_i32_0 : i32, i32
  }
  func.func @transform_6(%arg0: i32) -> (i32, i32) {
    %c0_i32 = arith.constant 0 : i32
    %c0_i32_0 = arith.constant 0 : i32
    %c0_i32_1 = arith.constant 0 : i32
    return %c0_i32, %c0_i32_0 : i32, i32
  }
  func.func @transform_7(%arg0: i32) -> (i32, i32) {
    %c0_i32 = arith.constant 0 : i32
    %c0_i32_0 = arith.constant 0 : i32
    %c0_i32_1 = arith.constant 0 : i32
    return %c0_i32, %c0_i32_0 : i32, i32
  }
  func.func @transform_8(%arg0: i32) -> (i32, i32) {
    %c0_i32 = arith.constant 0 : i32
    %c0_i32_0 = arith.constant 0 : i32
    %c0_i32_1 = arith.constant 0 : i32
    return %c0_i32, %c0_i32_0 : i32, i32
  }
  func.func @transform_9(%arg0: i32) -> (i32, i32) {
    %c0_i32 = arith.constant 0 : i32
    %c0_i32_0 = arith.constant 0 : i32
    %c0_i32_1 = arith.constant 0 : i32
    return %c0_i32, %c0_i32_0 : i32, i32
  }
  func.func @transform_10(%arg0: i32) -> (i32, i32) {
    %c0_i32 = arith.constant 0 : i32
    %c0_i32_0 = arith.constant 0 : i32
    %c0_i32_1 = arith.constant 0 : i32
    return %c0_i32, %c0_i32_0 : i32, i32
  }
  func.func @transform_11(%arg0: i32) -> (i32, i32) {
    %c0_i32 = arith.constant 0 : i32
    %c0_i32_0 = arith.constant 0 : i32
    %c0_i32_1 = arith.constant 0 : i32
    return %c0_i32, %c0_i32_0 : i32, i32
  }
  func.func @transform_12(%arg0: i32) -> (i32, i32) {
    %c0_i32 = arith.constant 0 : i32
    %c0_i32_0 = arith.constant 0 : i32
    %c0_i32_1 = arith.constant 0 : i32
    return %c0_i32, %c0_i32_0 : i32, i32
  }
  func.func @transform_13(%arg0: i32) -> (i32, i32) {
    %c0_i32 = arith.constant 0 : i32
    %c0_i32_0 = arith.constant 0 : i32
    %c0_i32_1 = arith.constant 0 : i32
    return %c0_i32, %c0_i32_0 : i32, i32
  }
  func.func @transform_14(%arg0: i32) -> (i32, i32, i32) {
    %c0_i32 = arith.constant 0 : i32
    %c0_i32_0 = arith.constant 0 : i32
    %c0_i32_1 = arith.constant 0 : i32
    return %arg0, %c0_i32, %c0_i32_0 : i32, i32, i32
  }
}

</mosaic_0001>

<bundles_post_ra>
// kernel: tpu_custom_call.1
= control target key start
LH: loop header
LB: loop body
LE: loop exit
PB: predicated region body
PF: predicated region fallthrough
CT: control target
= control target key end

     0   :  { %s9745_s0 = inlined_call_operand.vmem [shape: f32[2,16,32], index: 0, kind: input, shape index: {}]   ;;  %s9746_s1 = inlined_call_operand.hbm [shape: f32[16,16], index: 1, kind: input, shape index: {}]   ;;  %s9747_s2 = inlined_call_operand.vmem [shape: f32[1,32], index: 2, kind: input, shape index: {}]   ;;  %s9748_s3 = inlined_call_operand.vmem [shape: f32[1,32], index: 3, kind: input, shape index: {}]   ;;  %s9749_s4 = inlined_call_operand.vmem [shape: f32[32,96], index: 4, kind: input, shape index: {}]   ;;  %s9750_s5 = inlined_call_operand.vmem [shape: f32[1,96], index: 5, kind: input, shape index: {}]   ;;  %s9751_s6 = inlined_call_operand.vmem [shape: f32[32,32], index: 6, kind: input, shape index: {}]   ;;  %s9752_s7 = inlined_call_operand.vmem [shape: f32[1,32], index: 7, kind: input, shape index: {}]   ;;  %s9753_s8 = inlined_call_operand.vmem [shape: f32[1,32], index: 8, kind: input, shape index: {}]   ;;  %s9754_s9 = inlined_call_operand.vmem [shape: f32[1,32], index: 9, kind: input, shape index: {}]   ;;  %s9755_s10 = inlined_call_operand.hbm [shape: f32[32,64], index: 10, kind: input, shape index: {}]   ;;  %s9756_s11 = inlined_call_operand.vmem [shape: f32[1,64], index: 11, kind: input, shape index: {}]   ;;  %s9757_s12 = inlined_call_operand.vmem [shape: f32[64,32], index: 12, kind: input, shape index: {}]   ;;  %s9758_s13 = inlined_call_operand.vmem [shape: f32[1,32], index: 13, kind: input, shape index: {}]   ;;  %s9759_s14 = inlined_call_operand.hbm [shape: f32[2,16,32], index: 14, kind: output, shape index: {}]  }
   0x1   :  { %9772 = sst [smem:[#allocation18_spill]] %s9759_s14 }
   0x2   :  { %19 = vsyncpa [#allocation3], 0 }
   0x3   :  { %20 = vsyncpa [#allocation6], 0 }
   0x4   :  { %21 = vsyncpa [#allocation4], 0 }
   0x5   :  { %23 = vsyncpa [#allocation4 + $0x1], 0  ;;  %s9171_s29 = smov 0   ;;  %s9173_s30 = smov 0  }
   0x6   :  { %s9175_s15 = smov 0   ;;  %s9177_s16 = smov 0  }
   0x7 LB: > { %9773 = sst [smem:[#allocation11_spill]] %s9062_s29  ;;  %s9192_s17 = sadd.s32 4294967295, %s9074_s16   ;;  %s9074_s16 = sphi %s9177_s16, %s9796_s16   ;;  %s9070_s15 = sphi %s9175_s15, %s9798_s15   ;;  %s9066_s30 = sphi %s9173_s30, %s9800_s30   ;;  %s9062_s29 = sphi %s9171_s29, %s9799_s29  }
   0x8   : > { %9774 = sst [smem:[#allocation12_spill]] %s9070_s15  ;;  %s7227_s18 = sadd.s32 4294967294, %s9074_s16  }
   0x9   : > { %9775 = sst [smem:[#allocation13_spill]] %s9074_s16  ;;  %s9196_s19 = sadd.s32 1, %s9074_s16  }
   0xa   : > { %9776 = sst [smem:[#allocation14_spill]] %s9196_s19  ;;  %s335_s20 = sadd.s32 1, %s9070_s15 }
   0xb   : > { %s332_s21 = ssub.s32 %s9074_s16, %s9196_s19  ;;  %p345_p0 = scmp.ne.s32.totalorder %s9070_s15, %s9066_s30 }
   0xc   : > { %p333_p1 = scmp.eq.s32.totalorder %s332_s21, 0  ;;  %p346_p2 = scmp.eq.s32.totalorder %s9192_s17, 1 }
   0xd   : > { %p351_p3 = scmp.ne.s32.totalorder %s9066_s30, %s9062_s29  ;;  %p352_p4 = scmp.eq.s32.totalorder %s7227_s18, 1 }
   0xe   : > { %s9207_s22 = scalar_select %p333_p1, %s9070_s15, %s335_s20  }
   0xf   : > { %p9209_p5 = por %p346_p2, %p345_p0  ;;  %p9213_p6 = por %p352_p4, %p351_p3 }
  0x10   : > { %9777 = sst [smem:[#allocation15_spill]] %s9207_s22  ;;  %p7228_p7 = scmp.ge.s32.totalorder %s9074_s16, 1 }
  0x11   : > { %s9778_s23 = scalar_select %p9209_p5, 1, 0 }
  0x12   : > { %s9780_s24 = scalar_select %p9213_p6, 1, 0 }
  0x13   : > { %9779 = sst [smem:[#allocation16_spill]] %s9778_s23  ;;  %p359_p8 = scmp.lt.s32.totalorder %s9074_s16, 3 }
  0x14   : > { %9781 = sst [smem:[#allocation17_spill]] %s9780_s24  ;;  %p9765_p9 = scmp.eq.s32.totalorder %s9192_s17, 0 }
  0x15   : > { %p9220_p10 = pnand %p7228_p7, %p359_p8  ;;  %s9076_s26 = smov [#allocation2]  }
  0x16   : > { %s371_s27 = sshll.u32 %s9076_s26, 4  ;;  %s9077_s18 = smov [#allocation5]   ;;  %s372_s27 = int_to_ptr.vmem [resolvable:$true] %s371_s27 }
  0x17   : > { %s9782_s25 = scalar_select %p9220_p10, 1, 0 }
  0x18   : > { %p8831_p11 = pneg %p9220_p10  ;;  %s408_s20 = sshll.u32 %s9077_s18, 4  ;;  %s9232_s20 = int_to_ptr.vmem [resolvable:$true] %s408_s20 }
  0x19   : > { %s8948_s15 = scalar_lea.hbm %s9746_s1, 256 }
  0x1a   : > { %p9228_p12 = pnand %p9765_p9, %p8831_p11  ;;  %p8949_p13 = scmp.ne.s32.totalorder %s9746_s1, %s8948_s15 }
  0x1b   : > { %p8955_p3 = scmp.lt.u32.totalorder %s8948_s15, %s9746_s1 }
  0x1c   : > { %p8950_p0 = pneg %p9228_p12 }
  0x1e   : > { %p8951_p1 = pnand %p8950_p0, %p8949_p13 }
  0x20   : > { %p8952_p2 = pneg %p8951_p1 }
  0x22   : > { %p8957_p4 = pnand %p8955_p3, %p8952_p2 }
  0x24   : > { %8960 = shalt.err (!%p8957_p4)
}
  0x25   : > { %s8961_s18 = scalar_lea.vmem %s372_s27, 256  ;;  %p8969_p9 = scmp.lt.s32.totalorder %s372_s27, %s372_s27 }
  0x26   : > { %p8962_p7 = scmp.ne.s32.totalorder %s372_s27, %s8961_s18  ;;  %p8970_p6 = scmp.lt.s32.totalorder %s8961_s18, %s8961_s18 }
  0x28   : > { %p8964_p8 = pnand %p8962_p7, %p8950_p0  ;;  %p8971_p5 = por %p8970_p6, %p8969_p9 }
  0x2a   : > { %p8965_p11 = pneg %p8964_p8 }
  0x2c   : > { %p8972_p10 = pnand %p8971_p5, %p8965_p11 }
  0x2e   : > { %8975 = shalt.err (!%p8972_p10)
}
  0x2f   : > { %s9078_s19 = smov 128   ;;  %s9079_s22 = smov 8  }
  0x30   : > { %8834 = dma.hbm_to_vmem [thread:$0]  (!%p9228_p12), %s9746_s1, 256, %s372_s27, [#allocation3], %s9078_s19, %s9078_s19, %s9079_s22  }
  0x31   : > { %s8976_s26 = scalar_lea.hbm %s9755_s10, 512 }
  0x32   : > { %p8977_p13 = scmp.ne.s32.totalorder %s9755_s10, %s8976_s26  ;;  %p8983_p9 = scmp.lt.u32.totalorder %s8976_s26, %s9755_s10 }
  0x34   : > { %p8979_p5 = pnand %p8977_p13, %p8950_p0 }
  0x36   : > { %p8980_p6 = pneg %p8979_p5 }
  0x38   : > { %p8985_p10 = pnand %p8983_p9, %p8980_p6 }
  0x3a   : > { %8988 = shalt.err (!%p8985_p10)
}
  0x3b   : > { %s8989_s27 = scalar_lea.vmem %s9232_s20, 512  ;;  %p8997_p4 = scmp.lt.s32.totalorder %s9232_s20, %s9232_s20 }
  0x3c   : > { %p8990_p1 = scmp.ne.s32.totalorder %s9232_s20, %s8989_s27  ;;  %p8998_p7 = scmp.lt.s32.totalorder %s8989_s27, %s8989_s27 }
  0x3e   : > { %p8992_p2 = pnand %p8990_p1, %p8950_p0  ;;  %p8999_p8 = por %p8998_p7, %p8997_p4 }
  0x40   : > { %p8993_p3 = pneg %p8992_p2 }
  0x42   : > { %p9000_p11 = pnand %p8999_p8, %p8993_p3 }
  0x44   : > { %9003 = shalt.err (!%p9000_p11)
}
  0x45   : > { %8837 = dma.hbm_to_vmem [thread:$0]  (!%p9228_p12), %s9755_s10, 512, %s9232_s20, [#allocation6], %s9078_s19, %s9078_s19, %s9079_s22  }
  0x46   : > { %p9784_p13 = scmp.ne.s32.totalorder %s9782_s25, 0 }
  0x47   : > { %p9785_p5 = scmp.eq.s32.totalorder (!%p9784_p13), %s9192_s17, 0 }
  0x48   : > { %441 = sbr.rel (%p9784_p13) target bundleno = 4231 (0x1087), region = 76 }
  0x4f   : > { %9049 = dma.done.wait (%p9785_p5), [#allocation3], 256   ;;  %p9786_p0 = pmov %p9785_p5 }
  0x51   : > { %9051 = vsyncadd (%p9786_p0), [#allocation3], 4294967040  ;;  %p9787_p6 = pmov %p9786_p0 }
  0x52   : > { %p9788_p9 = pmov %p9786_p0 }
  0x53   : > { %9053 = dma.done.wait (%p9787_p6), [#allocation6], 512  }
  0x54   : > { %9055 = vsyncadd (%p9788_p9), [#allocation6], 4294966784  ;;  %p491_p10 = scmp.lt.s32.totalorder %s9192_s17, 1  ;;  %vm498_vm0 = vcmask 261120   ;;  %v559_v14 = vld [vmem:[%s9749_s4] sm:$0xff]  ;;  %v560_v15 = vld [vmem:[%s9749_s4 + $0x8] sm:$0xff] }
  0x55   : > { %v561_v16 = vld [vmem:[%s9749_s4 + $0x10] sm:$0xff]  ;;  %v577_v17 = vand.u32 4294901760, %v559_v14  ;;  %v580_v18 = vand.u32 4294901760, %v560_v15  ;;  %v562_v19 = vld [vmem:[%s9749_s4 + $0x18] sm:$0xff]  ;;  %v7238_v62 = vld [vmem:[%s9747_s2] ss:$0 sm:$0xff] }
  0x56   : > { %s492_s23 = scalar_select %p491_p10, %s9192_s17, 1  ;;  %v583_v20 = vand.u32 4294901760, %v561_v16  ;;  %v586_v21 = vand.u32 4294901760, %v562_v19  ;;  %vm1114_vm5 = vcmask 64512   ;;  %vm1629_vm7 = vcmask 130048  }
  0x57   : > { %v9324_v22 = vpack.c.bf16 %v580_v18, %v577_v17  ;;  %v667_v24 = vsub.f32 %v559_v14, %v577_v17  ;;  %v674_v25 = vsub.f32 %v560_v15, %v580_v18  ;;  %s9080_s22 = smov 96   ;;  %s9081_s29 = smov 88   ;;  %vm5368_vm9 = vcmask 195584  }
  0x58   : > { %s7251_s28 = sshll.u32 %s492_s23, 4  ;;  %v9326_v23 = vpack.c.bf16 %v586_v21, %v583_v20  ;;  %v681_v30 = vsub.f32 %v561_v16, %v583_v20  ;;  %v688_v31 = vsub.f32 %v562_v19, %v586_v21  ;;  %s9082_s15 = smov 120   ;;  %vm6538_vm14 = vcmask 523264  }
  0x59   : > { %s9296_s19 = scalar_lea.vmem %s9745_s0, %s7251_s28  ;;  %8262 = vmatprep.subr.bf16.mxu0 %v9324_v22  ;;  %v668_v26 = vand.u32 4294901760, %v667_v24  ;;  %v675_v27 = vand.u32 4294901760, %v674_v25  ;;  %v8277_v42 = vpack.c.bf16 %v674_v25, %v667_v24  ;;  %s9083_s24 = smov 64  }
  0x5a   : > { %v496_v0 = vld [vmem:[%s9296_s19] sm:$0xff]  ;;  %v497_v1 = vld [vmem:[%s9296_s19 + $0x8] sm:$0xff]  ;;  %8264 = vmatpush3.bf16.msra.mxu0 %v9324_v22  ;;  %v682_v34 = vand.u32 4294901760, %v681_v30  ;;  %v689_v35 = vand.u32 4294901760, %v688_v31  ;;  %v8281_v43 = vpack.c.bf16 %v688_v31, %v681_v30  ;;  %s9084_s21 = smov 56   ;;  %s9085_s26 = smov 80  }
  0x5b   : > { %v499_v2 = vsel %vm498_vm0, %v496_v0, 0.0  ;;  %v502_v3 = vsel %vm498_vm0, %v497_v1, 0.0  ;;  %8266 = vmatprep.subr.bf16.mxu0 %v9326_v23  ;;  %v669_v28 = vsub.f32 %v667_v24, %v668_v26  ;;  %v676_v29 = vsub.f32 %v674_v25, %v675_v27  ;;  %s9086_s18 = smov 112   ;;  %s9087_s27 = smov 48  }
  0x5c   : > { %500 = vadd.xlane.f32.xlu0 %v499_v2  ;;  %v683_v37 = vsub.f32 %v681_v30, %v682_v34  ;;  %v690_v38 = vsub.f32 %v688_v31, %v689_v35  ;;  %v9332_v44 = vpack.c.bf16 %v675_v27, %v668_v26  ;;  %v9334_v45 = vpack.c.bf16 %v689_v35, %v682_v34  ;;  %s9088_s14 = smov 72   ;;  %s9089_s16 = smov 104  }
  0x5d   : > { %v670_v32 = vand.u32 4294901760, %v669_v28  ;;  %v677_v33 = vand.u32 4294901760, %v676_v29  ;;  %s9090_s23 = smov 40   ;;  %s9091_s28 = smov 8  }
  0x5e   : > { %8268 = vmatpush3.bf16.msra.mxu0 %v9326_v23  ;;  %v684_v39 = vand.u32 4294901760, %v683_v37  ;;  %v691_v40 = vand.u32 4294901760, %v690_v38  ;;  %s9092_s20 = smov 16  }
  0x5f   : > { %v8269_v36 = vpack.c.bf16 %v677_v33, %v670_v32 }
  0x60   : > { %503 = vadd.xlane.f32.xlu0 %v502_v3  ;;  %v8273_v41 = vpack.c.bf16 %v691_v40, %v684_v39 }
  0x61   : > { %8270 = vmatprep.subr.bf16.mxu0 %v8269_v36 }
  0xe9   : > { %v501_v4 = vpop.xlane.xlu0 %500 }
  0xea   : > { %v506_v5 = vmul.f32 0.03125, %v501_v4 }
  0xec   : > { %v9302_v6 = vsub.f32 %v496_v0, %v506_v5 }
  0xed   : > { %v504_v7 = vpop.xlane.xlu0 %503 }
  0xee   : > { %v507_v8 = vmul.f32 0.03125, %v504_v7  ;;  %v510_v9 = vmul.f32 %v9302_v6, %v9302_v6  ;;  %v528_v63 = vmul.f32 %v7238_v62, %v9302_v6 }
  0xf0   : > { %v9306_v10 = vsub.f32 %v497_v1, %v507_v8  ;;  %v512_v11 = vsel %vm498_vm0, %v510_v9, 0.0  ;;  %v7239_v1 = vld [vmem:[%s9748_s3] ss:$0 sm:$0xff] }
  0xf1   : > { %513 = vadd.xlane.f32.xlu1 %v512_v11 }
  0xf2   : > { %v511_v12 = vmul.f32 %v9306_v10, %v9306_v10  ;;  %v529_v3 = vmul.f32 %v7238_v62, %v9306_v10  ;;  %v7240_v10 = vld [vmem:[%s9750_s5] ss:$0 sm:$0xff] }
  0xf4   : > { %v515_v13 = vsel %vm498_vm0, %v511_v12, 0.0 }
  0xf5   : > { %516 = vadd.xlane.f32.xlu1 %v515_v13 }
 0x17e   : > { %v514_v46 = vpop.xlane.xlu1 %513 }
 0x17f   : > { %v519_v47 = vmul.f32 0.032258064, %v514_v46 }
 0x181   : > { %8898 = vrsqrt.f32 %v519_v47  ;;  %vm532_vm1 = vcmp.eq.f32.partialorder %v519_v47, inf  ;;  %v535_v52 = vand.u32 2147483648, %v519_v47  ;;  %vm534_vm2 = vcmp.eq.f32.partialorder %v519_v47, 0.0 }
 0x182   : > { %v517_v48 = vpop.xlane.xlu1 %516 }
 0x183   : > { %v520_v49 = vmul.f32 0.032258064, %v517_v48 }
 0x185   : > { %8900 = vrsqrt.f32 %v520_v49  ;;  %vm539_vm3 = vcmp.eq.f32.partialorder %v520_v49, inf  ;;  %v542_v58 = vand.u32 2147483648, %v520_v49  ;;  %vm541_vm4 = vcmp.eq.f32.partialorder %v520_v49, 0.0 }
 0x18b   : > { %v8899_v50 = vpop.eup %8898 }
 0x18c   : > { %v531_v51 = vmul.f32 %v8899_v50, %v519_v47 }
 0x18e   : > { %v533_v53 = vsel %vm532_vm1, %v519_v47, %v531_v51 }
 0x18f   : > { %v8901_v54 = vpop.eup %8900  ;;  %v536_v55 = vsel %vm534_vm2, %v535_v52, %v533_v53 }
 0x190   : > { %v544_v56 = vadd.f32 1e-06, %v536_v55  ;;  %v538_v57 = vmul.f32 %v8901_v54, %v520_v49 }
 0x192   : > { %v540_v59 = vsel %vm539_vm3, %v520_v49, %v538_v57  ;;  %8902 = vrcp.f32 %v544_v56 }
 0x193   : > { %v543_v60 = vsel %vm541_vm4, %v542_v58, %v540_v59 }
 0x194   : > { %v545_v61 = vadd.f32 1e-06, %v543_v60 }
 0x196   : > { %8904 = vrcp.f32 %v545_v61 }
 0x19c   : > { %v8903_v0 = vpop.eup %8902 }
 0x19d   : > { %v547_v2 = vmul.f32 %v8903_v0, %v528_v63 }
 0x19f   : > { %v557_v4 = vadd.f32 %v7239_v1, %v547_v2 }
 0x1a0   : > { %v8905_v5 = vpop.eup %8904 }
 0x1a1   : > { %v549_v7 = vmul.f32 %v8905_v5, %v529_v3  ;;  %v571_v8 = vsel %vm498_vm0, %v557_v4, 0 }
 0x1a2   : > { %v645_v9 = vand.u32 4294901760, %v571_v8 }
 0x1a3   : > { %v558_v11 = vadd.f32 %v7239_v1, %v549_v7 }
 0x1a4   : > { %v646_v12 = vsub.f32 %v571_v8, %v645_v9 }
 0x1a5   : > { %v574_v13 = vsel %vm498_vm0, %v558_v11, 0 }
 0x1a6   : > { %v647_v14 = vand.u32 4294901760, %v646_v12  ;;  %v655_v6 = vand.u32 4294901760, %v574_v13 }
 0x1a8   : > { %v648_v15 = vsub.f32 %v646_v12, %v647_v14  ;;  %v656_v16 = vsub.f32 %v574_v13, %v655_v6 }
 0x1aa   : > { %v649_v17 = vand.u32 4294901760, %v648_v15  ;;  %v657_v18 = vand.u32 4294901760, %v656_v16 }
 0x1ac   : > { %7621 = vmatprep.mubr.f32.mxu0 %v649_v17  ;;  %v658_v19 = vsub.f32 %v656_v16, %v657_v18 }
 0x1ae   : > { %v659_v20 = vand.u32 4294901760, %v658_v19 }
 0x1b0   : > { %7622 = vmatmul.mubr.f32.vlgmr.msra.gmra.mrb[0].mxu0 %v659_v20 }
 0x1b1   : > { %8272 = vmatpush3.bf16.msra.mxu0 %v8269_v36  ;;  %7632 = vmatprep.mubr.f32.mxu0 %v645_v9 }
 0x1b2   : > { %8274 = vmatprep.subr.bf16.mxu0 %v8273_v41 }
 0x1b5   : > { %8276 = vmatpush3.bf16.msra.mxu0 %v8273_v41 }
 0x1b6   : > { %8278 = vmatprep.subr.bf16.mxu0 %v8277_v42 }
 0x1b8   : > { %7633 = vmatmul.mubr.f32.vlgmr.msra.gmra.mrb[0].mxu0 %v655_v6 }
 0x1b9   : > { %8280 = vmatpush3.bf16.msra.mxu0 %v8277_v42  ;;  %7643 = vmatprep.mubr.f32.mxu0 %v646_v12 }
 0x1ba   : > { %8282 = vmatprep.subr.bf16.mxu0 %v8281_v43 }
 0x1bd   : > { %8284 = vmatpush3.bf16.msra.mxu0 %v8281_v43 }
 0x1be   : > { %8286 = vmatprep.subr.bf16.mxu0 %v9324_v22 }
 0x1c0   : > { %7644 = vmatmul.mubr.f32.vlgmr.msra.gmra.mrb[0].mxu0 %v656_v16 }
 0x1c1   : > { %8288 = vmatpush3.bf16.msra.mxu0 %v9324_v22  ;;  %7654 = vmatprep.mubr.f32.mxu0 %v647_v14 }
 0x1c2   : > { %8290 = vmatprep.subr.bf16.mxu0 %v9326_v23 }
 0x1c5   : > { %8292 = vmatpush3.bf16.msra.mxu0 %v9326_v23 }
 0x1c6   : > { %8294 = vmatprep.subr.bf16.mxu0 %v9332_v44 }
 0x1c8   : > { %7655 = vmatmul.mubr.f32.vlgmr.msra.gmra.mrb[0].mxu0 %v657_v18 }
 0x1c9   : > { %8296 = vmatpush3.bf16.msra.mxu0 %v9332_v44  ;;  %7665 = vmatprep.mubr.f32.mxu0 %v645_v9 }
 0x1ca   : > { %8298 = vmatprep.subr.bf16.mxu0 %v9334_v45 }
 0x1cd   : > { %8300 = vmatpush3.bf16.msra.mxu0 %v9334_v45 }
 0x1ce   : > { %8302 = vmatprep.subr.bf16.mxu0 %v9324_v22 }
 0x1d0   : > { %7666 = vmatmul.mubr.f32.vlgmr.msra.gmra.mrb[0].mxu0 %v655_v6 }
 0x1d1   : > { %8304 = vmatpush3.bf16.msra.mxu0 %v9324_v22  ;;  %7676 = vmatprep.mubr.f32.mxu0 %v645_v9 }
 0x1d2   : > { %8306 = vmatprep.subr.bf16.mxu0 %v9326_v23 }
 0x1d5   : > { %8308 = vmatpush3.bf16.msra.mxu0 %v9326_v23 }
 0x1d8   : > { %7677 = vmatmul.mubr.f32.vlgmr.msra.gmra.mrb[0].mxu0 %v655_v6 }
 0x2ab   : > { %v7678_v21 = vpop.f32.mrb[0].mxu0 }
 0x2ac   : > { %v9361_v24 = vadd.f32 %v7678_v21, %v7240_v10  ;;  %v1094_v25 = vpop.f32.mrb[1].mxu0 }
 0x2ad   : > { %v9363_v26 = vadd.f32 %v7240_v10, %v1094_v25 }
 0x2ae   : > { %1112 = vrot.lane.b32.xlu1 %v9361_v24, %s9080_s22  ;;  %v1117_v31 = vsel %vm1114_vm5, %v9361_v24, 0 }
 0x2af   : > { %1110 = vrot.lane.b32.xlu0 %v9363_v26, %s9080_s22  ;;  %v1115_v22 = vsel %vm1114_vm5, %v9363_v26, 0  ;;  %v9378_v32 = vand.u32 4294901760, %v1117_v31  ;;  %s9790_s22 = sld [smem:[#allocation18_spill]] }
 0x2b0   : > { %v9369_v23 = vand.u32 4294901760, %v1115_v22 }
 0x2b1   : > { %v1201_v36 = vsub.f32 %v1117_v31, %v9378_v32 }
 0x2b2   : > { %2172 = vrot.lane.b32.xlu1 %v9361_v24, %s9081_s29  ;;  %v1191_v27 = vsub.f32 %v1115_v22, %v9369_v23  ;;  %v9393_v22 = vld [vmem:[#allocation2 + $0x8] sm:$0xff] }
 0x2b3   : > { %2166 = vrot.lane.b32.xlu0 %v9363_v26, %s9082_s15  ;;  %v1202_v43 = vand.u32 4294901760, %v1201_v36  ;;  %vm1107_vm6 = vcmp.gt.f32.partialorder %v9393_v22, 0.0 }
 0x2b4   : > { %v1192_v28 = vand.u32 4294901760, %v1191_v27 }
 0x2b5   : > { %v1203_v48 = vsub.f32 %v1201_v36, %v1202_v43 }
 0x2b6   : > { %2170 = vrot.lane.b32.xlu1 %v9363_v26, %s9081_s29  ;;  %v1193_v29 = vsub.f32 %v1191_v27, %v1192_v28 }
 0x2b7   : > { %v1204_v51 = vand.u32 4294901760, %v1203_v48 }
 0x2b8   : > { %v1194_v30 = vand.u32 4294901760, %v1193_v29 }
 0x2ba   : > { %2168 = vrot.lane.b32.xlu1 %v9361_v24, %s9082_s15  ;;  %7683 = vmatprep.mubr.f32.mxu1 %v1194_v30 }
 0x320   : > { %v1113_v33 = vpop.permute.xlu1 %1112 }
 0x321   : > { %v1121_v34 = vsel %vm1114_vm5, %v1113_v33, 0  ;;  %v1111_v35 = vpop.permute.xlu0 %1110 }
 0x322   : > { %v1127_v37 = vand.u32 4294901760, %v1121_v34  ;;  %v1119_v38 = vsel %vm1114_vm5, %v1111_v35, 0 }
 0x323   : > { %v1124_v39 = vand.u32 4294901760, %v1119_v38 }
 0x324   : > { %v1219_v40 = vsub.f32 %v1121_v34, %v1127_v37  ;;  %v2173_v54 = vpop.permute.xlu1 %2172 }
 0x325   : > { %v8309_v41 = vpack.c.bf16 %v1127_v37, %v1124_v39  ;;  %v1212_v42 = vsub.f32 %v1119_v38, %v1124_v39  ;;  %v2167_v57 = vpop.permute.xlu0 %2166  ;;  %v2180_v59 = vsel %vm1114_vm5, %v2173_v54, 0 }
 0x326   : > { %v1220_v44 = vand.u32 4294901760, %v1219_v40  ;;  %v2174_v60 = vsel %vm1114_vm5, %v2167_v57, 0  ;;  %v2186_v62 = vand.u32 4294901760, %v2180_v59 }
 0x327   : > { %v1213_v45 = vand.u32 4294901760, %v1212_v42  ;;  %8310 = vmatprep.subr.bf16.mxu1 %v8309_v41  ;;  %v8317_v53 = vpack.c.bf16 %v1219_v40, %v1212_v42  ;;  %v2249_v63 = vand.u32 4294901760, %v2174_v60 }
 0x328   : > { %v1221_v46 = vsub.f32 %v1219_v40, %v1220_v44  ;;  %8312 = vmatpush3.bf16.xpose.msra.mxu1 %v8309_v41  ;;  %v2171_v55 = vpop.permute.xlu1 %2170  ;;  %v2278_v2 = vsub.f32 %v2180_v59, %v2186_v62 }
 0x329   : > { %v1214_v47 = vsub.f32 %v1212_v42, %v1213_v45  ;;  %v8325_v56 = vpack.c.bf16 %v1220_v44, %v1213_v45  ;;  %v2178_v58 = vsel %vm1114_vm5, %v2171_v55, 0  ;;  %v2250_v3 = vsub.f32 %v2174_v60, %v2249_v63 }
 0x32a   : > { %v1222_v49 = vand.u32 4294901760, %v1221_v46  ;;  %v2183_v61 = vand.u32 4294901760, %v2178_v58  ;;  %v2279_v7 = vand.u32 4294901760, %v2278_v2 }
 0x32b   : > { %v1215_v50 = vand.u32 4294901760, %v1214_v47  ;;  %v2251_v9 = vand.u32 4294901760, %v2250_v3 }
 0x32c   : > { %v2271_v0 = vsub.f32 %v2178_v58, %v2183_v61  ;;  %v2169_v1 = vpop.permute.xlu1 %2168  ;;  %v8357_v11 = vpack.c.bf16 %v2186_v62, %v2183_v61  ;;  %v2280_v13 = vsub.f32 %v2278_v2, %v2279_v7 }
 0x32d   : > { %v8313_v52 = vpack.c.bf16 %v1222_v49, %v1215_v50  ;;  %v2176_v4 = vsel %vm1114_vm5, %v2169_v1, 0  ;;  %v2252_v6 = vsub.f32 %v2250_v3, %v2251_v9 }
 0x32e   : > { %v2272_v5 = vand.u32 4294901760, %v2271_v0  ;;  %v2259_v8 = vand.u32 4294901760, %v2176_v4  ;;  %v2281_v17 = vand.u32 4294901760, %v2280_v13  ;;  %v8365_v21 = vpack.c.bf16 %v2278_v2, %v2271_v0 }
 0x32f   : > { %7684 = vmatmul.mubr.f32.vlgmr.msra.gmra.mrb[0].mxu1 %v1204_v51  ;;  %8314 = vmatprep.subr.bf16.mxu1 %v8313_v52  ;;  %v2253_v18 = vand.u32 4294901760, %v2252_v6 }
 0x330   : > { %8316 = vmatpush3.bf16.xpose.msra.mxu1 %v8313_v52  ;;  %7690 = vmatprep.mubr.f32.mxu1 %v9369_v23  ;;  %v2273_v12 = vsub.f32 %v2271_v0, %v2272_v5  ;;  %v2260_v14 = vsub.f32 %v2176_v4, %v2259_v8  ;;  %v8373_v25 = vpack.c.bf16 %v2279_v7, %v2272_v5 }
 0x331   : > { %8318 = vmatprep.subr.bf16.mxu1 %v8317_v53 }
 0x332   : > { %v2274_v15 = vand.u32 4294901760, %v2273_v12  ;;  %v2261_v16 = vand.u32 4294901760, %v2260_v14 }
 0x334   : > { %v8361_v19 = vpack.c.bf16 %v2281_v17, %v2274_v15  ;;  %v2262_v20 = vsub.f32 %v2260_v14, %v2261_v16 }
 0x336   : > { %v2263_v10 = vand.u32 4294901760, %v2262_v20 }
 0x337   : > { %7691 = vmatmul.mubr.f32.vlgmr.msra.gmra.mrb[0].mxu1 %v9378_v32 }
 0x338   : > { %8320 = vmatpush3.bf16.xpose.msra.mxu1 %v8317_v53  ;;  %7697 = vmatprep.mubr.f32.mxu1 %v1191_v27 }
 0x339   : > { %8322 = vmatprep.subr.bf16.mxu1 %v8309_v41 }
 0x33f   : > { %7698 = vmatmul.mubr.f32.vlgmr.msra.gmra.mrb[0].mxu1 %v1201_v36 }
 0x340   : > { %8324 = vmatpush3.bf16.xpose.msra.mxu1 %v8309_v41  ;;  %7704 = vmatprep.mubr.f32.mxu1 %v1192_v28 }
 0x341   : > { %8326 = vmatprep.subr.bf16.mxu1 %v8325_v56 }
 0x347   : > { %7705 = vmatmul.mubr.f32.vlgmr.msra.gmra.mrb[0].mxu1 %v1202_v43 }
 0x348   : > { %8328 = vmatpush3.bf16.xpose.msra.mxu1 %v8325_v56  ;;  %7711 = vmatprep.mubr.f32.mxu1 %v9369_v23 }
 0x349   : > { %8330 = vmatprep.subr.bf16.mxu1 %v8309_v41 }
 0x34f   : > { %7712 = vmatmul.mubr.f32.vlgmr.msra.gmra.mrb[0].mxu1 %v9378_v32 }
 0x350   : > { %8332 = vmatpush3.bf16.xpose.msra.mxu1 %v8309_v41  ;;  %7718 = vmatprep.mubr.f32.mxu1 %v9369_v23  ;;  %v9395_v23 = vld [vmem:[#allocation2] sm:$0xff] }
 0x351   : > { %8358 = vmatprep.subr.bf16.mxu1 %v8357_v11  ;;  %vm1106_vm8 = vcmp.gt.f32.partialorder %v9395_v23, 0.0 }
 0x357   : > { %7719 = vmatmul.mubr.f32.vlgmr.msra.gmra.mrb[0].mxu1 %v9378_v32 }
 0x358   : > { %8360 = vmatpush3.bf16.xpose.msra.mxu1 %v8357_v11  ;;  %7767 = vmatprep.mubr.f32.mxu1 %v2253_v18 }
 0x359   : > { %8362 = vmatprep.subr.bf16.mxu1 %v8361_v19 }
 0x35f   : > { %7768 = vmatmul.mubr.f32.vlgmr.msra.gmra.mrb[2].mxu1 %v2263_v10 }
 0x360   : > { %8364 = vmatpush3.bf16.xpose.msra.mxu1 %v8361_v19  ;;  %7774 = vmatprep.mubr.f32.mxu1 %v2249_v63 }
 0x361   : > { %8366 = vmatprep.subr.bf16.mxu1 %v8365_v21 }
 0x367   : > { %7775 = vmatmul.mubr.f32.vlgmr.msra.gmra.mrb[2].mxu1 %v2259_v8 }
 0x368   : > { %8368 = vmatpush3.bf16.xpose.msra.mxu1 %v8365_v21  ;;  %7781 = vmatprep.mubr.f32.mxu1 %v2250_v3 }
 0x369   : > { %8370 = vmatprep.subr.bf16.mxu1 %v8357_v11 }
 0x36f   : > { %7782 = vmatmul.mubr.f32.vlgmr.msra.gmra.mrb[2].mxu1 %v2260_v14 }
 0x370   : > { %8372 = vmatpush3.bf16.xpose.msra.mxu1 %v8357_v11  ;;  %7788 = vmatprep.mubr.f32.mxu1 %v2251_v9 }
 0x371   : > { %8374 = vmatprep.subr.bf16.mxu1 %v8373_v25 }
 0x377   : > { %7789 = vmatmul.mubr.f32.vlgmr.msra.gmra.mrb[2].mxu1 %v2261_v16 }
 0x378   : > { %8376 = vmatpush3.bf16.xpose.msra.mxu1 %v8373_v25  ;;  %7795 = vmatprep.mubr.f32.mxu1 %v2249_v63 }
 0x379   : > { %8378 = vmatprep.subr.bf16.mxu1 %v8357_v11 }
 0x37f   : > { %7796 = vmatmul.mubr.f32.vlgmr.msra.gmra.mrb[2].mxu1 %v2259_v8 }
 0x380   : > { %8380 = vmatpush3.bf16.xpose.msra.mxu1 %v8357_v11  ;;  %7802 = vmatprep.mubr.f32.mxu1 %v2249_v63 }
 0x387   : > { %7803 = vmatmul.mubr.f32.vlgmr.msra.gmra.mrb[2].mxu1 %v2259_v8 }
 0x42a   : > { %v7720_v27 = vpop.f32.mrb[0].mxu1 }
 0x42b   : > { %v1626_v28 = vmul.f32 0.35355338, %v7720_v27  ;;  %v1615_v29 = vpop.f32.mrb[1].mxu1 }
 0x42c   : > { %v1625_v30 = vmul.f32 0.35355338, %v1615_v29 }
 0x42d   : > { %v1628_v31 = vsel %vm1107_vm6, %v1626_v28, -1e+09 }
 0x42e   : > { %v1633_v32 = vsel %vm1629_vm7, %v1628_v31, -inf  ;;  %v1627_v33 = vsel %vm1106_vm8, %v1625_v30, -1e+09 }
 0x42f   : > { %1634 = vmax.xlane.f32.xlu1 %v1633_v32  ;;  %v1630_v34 = vsel %vm1629_vm7, %v1627_v33, -inf }
 0x430   : > { %1631 = vmax.xlane.f32.xlu0 %v1630_v34 }
 0x45a   : > { %v7804_v35 = vpop.f32.mrb[2].mxu1 }
 0x45b   : > { %v2674_v36 = vpop.f32.mrb[3].mxu1  ;;  %v2685_v37 = vmul.f32 0.35355338, %v7804_v35 }
 0x45c   : > { %v2684_v38 = vmul.f32 0.35355338, %v2674_v36 }
 0x45d   : > { %v2687_v41 = vsel %vm1107_vm6, %v2685_v37, -1e+09 }
 0x45e   : > { %v2686_v39 = vsel %vm1106_vm8, %v2684_v38, -1e+09  ;;  %v2691_v42 = vsel %vm1629_vm7, %v2687_v41, -inf }
 0x45f   : > { %v2688_v40 = vsel %vm1629_vm7, %v2686_v39, -inf }
 0x460   : > { %2689 = vmax.xlane.f32.xlu0 %v2688_v40 }
 0x464   : > { %2692 = vmax.xlane.f32.xlu0 %v2691_v42 }
 0x4bc   : > { %v1635_v43 = vpop.xlane.xlu1 %1634 }
 0x4bd   : > { %v1637_v44 = vsub.f32 %v1628_v31, %v1635_v43  ;;  %v1632_v45 = vpop.xlane.xlu0 %1631 }
 0x4be   : > { %v1636_v46 = vsub.f32 %v1627_v33, %v1632_v45 }
 0x4bf   : > { %v1640_v47 = vmul.f32 1.442695, %v1637_v44 }
 0x4c0   : > { %v1638_v48 = vmul.f32 1.442695, %v1636_v46 }
 0x4c1   : > { %8906 = vpow2.f32 %v1640_v47 }
 0x4c2   : > { %8908 = vpow2.f32 %v1638_v48 }
 0x4cb   : > { %v8907_v49 = vpop.eup %8906 }
 0x4cc   : > { %v8909_v50 = vpop.eup %8908  ;;  %v1645_v51 = vsel %vm1629_vm7, %v8907_v49, 0.0 }
 0x4cd   : > { %1646 = vadd.xlane.f32.xlu1 %v1645_v51  ;;  %v1642_v52 = vsel %vm1629_vm7, %v8909_v50, 0.0 }
 0x4ce   : > { %1643 = vadd.xlane.f32.xlu0 %v1642_v52 }
 0x4de   : > { %1654 = vrot.lane.b32.xlu1 %v9361_v24, %s9083_s24 }
 0x4e4   : > { %1652 = vrot.lane.b32.xlu0 %v9363_v26, %s9083_s24  ;;  %s9094_s24 = smov [#allocation7]  }
 0x4ed   : > { %v2690_v53 = vpop.xlane.xlu0 %2689 }
 0x4ee   : > { %v2694_v54 = vsub.f32 %v2686_v39, %v2690_v53 }
 0x4f0   : > { %v2696_v55 = vmul.f32 1.442695, %v2694_v54 }
 0x4f1   : > { %v2693_v56 = vpop.xlane.xlu0 %2692 }
 0x4f2   : > { %v2695_v57 = vsub.f32 %v2687_v41, %v2693_v56  ;;  %8910 = vpow2.f32 %v2696_v55 }
 0x4f4   : > { %v2698_v58 = vmul.f32 1.442695, %v2695_v57 }
 0x4f6   : > { %8912 = vpow2.f32 %v2698_v58 }
 0x4fc   : > { %v9415_v59 = vpop.eup %8910 }
 0x4fd   : > { %v2700_v61 = vsel %vm1629_vm7, %v9415_v59, 0.0 }
 0x500   : > { %v9417_v60 = vpop.eup %8912 }
 0x501   : > { %v2703_v62 = vsel %vm1629_vm7, %v9417_v60, 0.0 }
 0x502   : > { %2701 = vadd.xlane.f32.xlu1 %v2700_v61 }
 0x503   : > { %2704 = vadd.xlane.f32.xlu0 %v2703_v62 }
 0x513   : > { %2712 = vrot.lane.b32.xlu1 %v9361_v24, %s9084_s21 }
 0x517   : > { %3228 = vrot.lane.b32.xlu1 %v9363_v26, %s9085_s26 }
 0x519   : > { %2710 = vrot.lane.b32.xlu0 %v9363_v26, %s9084_s21  ;;  %s488_s21 = sand.u32 1, %s9066_s30  }
 0x51b   : > { %3230 = vrot.lane.b32.xlu1 %v9361_v24, %s9085_s26  ;;  %s7235_s26 = sshll.u32 %s488_s21, 4 }
 0x51d   : > { %3224 = vrot.lane.b32.xlu0 %v9363_v26, %s9086_s18 }
 0x51f   : > { %3226 = vrot.lane.b32.xlu1 %v9361_v24, %s9086_s18 }
 0x55a   : > { %v1647_v63 = vpop.xlane.xlu1 %1646 }
 0x55b   : > { %8914 = vrcp.f32 %v1647_v63  ;;  %v1644_v0 = vpop.xlane.xlu0 %1643 }
 0x55c   : > { %8916 = vrcp.f32 %v1644_v0 }
 0x55e   : > { %v1655_v1 = vpop.permute.xlu1 %1654 }
 0x55f   : > { %v1668_v2 = vand.u32 4294901760, %v1655_v1  ;;  %v1653_v3 = vpop.permute.xlu0 %1652 }
 0x560   : > { %v1665_v4 = vand.u32 4294901760, %v1653_v3 }
 0x561   : > { %v1760_v5 = vsub.f32 %v1655_v1, %v1668_v2 }
 0x562   : > { %v8333_v7 = vpack.c.bf16 %v1668_v2, %v1665_v4  ;;  %v1753_v8 = vsub.f32 %v1653_v3, %v1665_v4 }
 0x563   : > { %v1761_v9 = vand.u32 4294901760, %v1760_v5 }
 0x564   : > { %v1754_v11 = vand.u32 4294901760, %v1753_v8  ;;  %8334 = vmatprep.subr.bf16.mxu0 %v8333_v7  ;;  %v8341_v35 = vpack.c.bf16 %v1760_v5, %v1753_v8 }
 0x565   : > { %v8915_v12 = vpop.eup %8914  ;;  %v1762_v13 = vsub.f32 %v1760_v5, %v1761_v9  ;;  %8336 = vmatpush3.bf16.msra.mxu0 %v8333_v7 }
 0x566   : > { %v8917_v14 = vpop.eup %8916  ;;  %v1651_v6 = vmul.f32 %v8915_v12, %v8907_v49  ;;  %v1755_v15 = vsub.f32 %v1753_v8, %v1754_v11  ;;  %v8349_v36 = vpack.c.bf16 %v1761_v9, %v1754_v11 }
 0x567   : > { %v1649_v16 = vmul.f32 %v8917_v14, %v8909_v50  ;;  %v1763_v17 = vand.u32 4294901760, %v1762_v13 }
 0x568   : > { %v1756_v18 = vand.u32 4294901760, %v1755_v15  ;;  %v1662_v19 = vsel %vm1629_vm7, %v1651_v6, 0 }
 0x569   : > { %v1659_v20 = vsel %vm1629_vm7, %v1649_v16, 0  ;;  %v1741_v10 = vand.u32 4294901760, %v1662_v19 }
 0x56a   : > { %v8337_v21 = vpack.c.bf16 %v1763_v17, %v1756_v18  ;;  %v1731_v25 = vand.u32 4294901760, %v1659_v20 }
 0x56b   : > { %v1742_v27 = vsub.f32 %v1662_v19, %v1741_v10 }
 0x56c   : > { %8338 = vmatprep.subr.bf16.mxu0 %v8337_v21  ;;  %v1732_v28 = vsub.f32 %v1659_v20, %v1731_v25 }
 0x56d   : > { %v1743_v29 = vand.u32 4294901760, %v1742_v27 }
 0x56e   : > { %v1733_v30 = vand.u32 4294901760, %v1732_v28 }
 0x56f   : > { %v1744_v31 = vsub.f32 %v1742_v27, %v1743_v29 }
 0x570   : > { %v1734_v32 = vsub.f32 %v1732_v28, %v1733_v30 }
 0x571   : > { %v1745_v34 = vand.u32 4294901760, %v1744_v31 }
 0x572   : > { %v1735_v33 = vand.u32 4294901760, %v1734_v32 }
 0x574   : > { %7725 = vmatprep.mubr.f32.mxu0 %v1735_v33 }
 0x575   : > { %7726 = vmatmul.mubr.f32.vlgmr.msra.gmra.mrb[2].mxu0 %v1745_v34 }
 0x576   : > { %8340 = vmatpush3.bf16.msra.mxu0 %v8337_v21  ;;  %7732 = vmatprep.mubr.f32.mxu0 %v1731_v25 }
 0x577   : > { %8342 = vmatprep.subr.bf16.mxu0 %v8341_v35 }
 0x57d   : > { %7733 = vmatmul.mubr.f32.vlgmr.msra.gmra.mrb[2].mxu0 %v1741_v10 }
 0x57e   : > { %8344 = vmatpush3.bf16.msra.mxu0 %v8341_v35  ;;  %7739 = vmatprep.mubr.f32.mxu0 %v1732_v28 }
 0x57f   : > { %8346 = vmatprep.subr.bf16.mxu0 %v8333_v7 }
 0x585   : > { %7740 = vmatmul.mubr.f32.vlgmr.msra.gmra.mrb[2].mxu0 %v1742_v27 }
 0x586   : > { %8348 = vmatpush3.bf16.msra.mxu0 %v8333_v7  ;;  %7746 = vmatprep.mubr.f32.mxu0 %v1733_v30 }
 0x587   : > { %8350 = vmatprep.subr.bf16.mxu0 %v8349_v36 }
 0x58d   : > { %7747 = vmatmul.mubr.f32.vlgmr.msra.gmra.mrb[2].mxu0 %v1743_v29 }
 0x58e   : > { %8352 = vmatpush3.bf16.msra.mxu0 %v8349_v36  ;;  %7753 = vmatprep.mubr.f32.mxu0 %v1731_v25 }
 0x58f   : > { %8354 = vmatprep.subr.bf16.mxu0 %v8333_v7  ;;  %v2702_v37 = vpop.xlane.xlu1 %2701 }
 0x590   : > { %8918 = vrcp.f32 %v2702_v37  ;;  %v2705_v38 = vpop.xlane.xlu0 %2704 }
 0x591   : > { %8920 = vrcp.f32 %v2705_v38 }
 0x593   : > { %v2713_v39 = vpop.permute.xlu1 %2712 }
 0x594   : > { %v2726_v40 = vand.u32 4294901760, %v2713_v39  ;;  %v2711_v41 = vpop.permute.xlu0 %2710 }
 0x595   : > { %v2723_v42 = vand.u32 4294901760, %v2711_v41  ;;  %7754 = vmatmul.mubr.f32.vlgmr.msra.gmra.mrb[2].mxu0 %v1741_v10 }
 0x596   : > { %v2818_v43 = vsub.f32 %v2713_v39, %v2726_v40  ;;  %8356 = vmatpush3.bf16.msra.mxu0 %v8333_v7  ;;  %7760 = vmatprep.mubr.f32.mxu0 %v1731_v25 }
 0x597   : > { %v9431_v44 = vpack.c.bf16 %v2726_v40, %v2723_v42  ;;  %v2811_v45 = vsub.f32 %v2711_v41, %v2723_v42  ;;  %v3229_v7 = vpop.permute.xlu1 %3228 }
 0x598   : > { %v2819_v46 = vand.u32 4294901760, %v2818_v43  ;;  %v3225_v11 = vpop.permute.xlu0 %3224  ;;  %v3236_v13 = vsel %vm1114_vm5, %v3229_v7, 0 }
 0x599   : > { %v2812_v47 = vand.u32 4294901760, %v2811_v45  ;;  %8382 = vmatprep.subr.bf16.mxu0 %v9431_v44  ;;  %v8389_v5 = vpack.c.bf16 %v2818_v43, %v2811_v45  ;;  %v3232_v14 = vsel %vm1114_vm5, %v3225_v11, 0  ;;  %v3241_v15 = vand.u32 4294901760, %v3236_v13 }
 0x59a   : > { %v8919_v48 = vpop.eup %8918  ;;  %v2820_v49 = vsub.f32 %v2818_v43, %v2819_v46  ;;  %v3307_v16 = vand.u32 4294901760, %v3232_v14 }
 0x59b   : > { %v8921_v50 = vpop.eup %8920  ;;  %v2707_v51 = vmul.f32 %v8919_v48, %v9415_v59  ;;  %v2813_v52 = vsub.f32 %v2811_v45, %v2812_v47  ;;  %v3231_v8 = vpop.permute.xlu1 %3230  ;;  %v8397_v9 = vpack.c.bf16 %v2819_v46, %v2812_v47  ;;  %v3329_v19 = vsub.f32 %v3236_v13, %v3241_v15 }
 0x59c   : > { %v2709_v53 = vmul.f32 %v8921_v50, %v9417_v60  ;;  %v2821_v54 = vand.u32 4294901760, %v2820_v49  ;;  %v3238_v12 = vsel %vm1114_vm5, %v3231_v8, 0  ;;  %v3308_v20 = vsub.f32 %v3232_v14, %v3307_v16 }
 0x59d   : > { %7761 = vmatmul.mubr.f32.vlgmr.msra.gmra.mrb[2].mxu0 %v1741_v10  ;;  %v2814_v55 = vand.u32 4294901760, %v2813_v52  ;;  %v2717_v56 = vsel %vm1629_vm7, %v2707_v51, 0  ;;  %v3244_v6 = vand.u32 4294901760, %v3238_v12  ;;  %v3330_v25 = vand.u32 4294901760, %v3329_v19 }
 0x59e   : > { %8384 = vmatpush3.bf16.msra.mxu0 %v9431_v44  ;;  %v2789_v57 = vand.u32 4294901760, %v2717_v56  ;;  %v2720_v58 = vsel %vm1629_vm7, %v2709_v53, 0  ;;  %v3309_v27 = vand.u32 4294901760, %v3308_v20 }
 0x59f   : > { %v8385_v61 = vpack.c.bf16 %v2821_v54, %v2814_v55  ;;  %v2799_v63 = vand.u32 4294901760, %v2720_v58  ;;  %v3336_v17 = vsub.f32 %v3238_v12, %v3244_v6  ;;  %v3227_v18 = vpop.permute.xlu1 %3226  ;;  %v8405_v29 = vpack.c.bf16 %v3244_v6, %v3241_v15 }
 0x5a0   : > { %v2790_v62 = vsub.f32 %v2717_v56, %v2789_v57  ;;  %v3234_v10 = vsel %vm1114_vm5, %v3227_v18, 0  ;;  %v3331_v31 = vsub.f32 %v3329_v19, %v3330_v25  ;;  %v3310_v33 = vsub.f32 %v3308_v20, %v3309_v27 }
 0x5a1   : > { %8386 = vmatprep.subr.bf16.mxu0 %v8385_v61  ;;  %v2800_v1 = vsub.f32 %v2720_v58, %v2799_v63  ;;  %v3337_v21 = vand.u32 4294901760, %v3336_v17  ;;  %v3317_v28 = vand.u32 4294901760, %v3234_v10  ;;  %v8413_v41 = vpack.c.bf16 %v3336_v17, %v3329_v19 }
 0x5a2   : > { %v2791_v0 = vand.u32 4294901760, %v2790_v62  ;;  %v3311_v36 = vand.u32 4294901760, %v3310_v33  ;;  %v3332_v37 = vand.u32 4294901760, %v3331_v31 }
 0x5a3   : > { %v2801_v2 = vand.u32 4294901760, %v2800_v1  ;;  %v3338_v30 = vsub.f32 %v3336_v17, %v3337_v21  ;;  %v3318_v32 = vsub.f32 %v3234_v10, %v3317_v28  ;;  %v8421_v42 = vpack.c.bf16 %v3337_v21, %v3330_v25 }
 0x5a4   : > { %v2792_v59 = vsub.f32 %v2790_v62, %v2791_v0 }
 0x5a5   : > { %v2802_v60 = vsub.f32 %v2800_v1, %v2801_v2  ;;  %v3339_v34 = vand.u32 4294901760, %v3338_v30  ;;  %v3319_v35 = vand.u32 4294901760, %v3318_v32 }
 0x5a6   : > { %v2793_v3 = vand.u32 4294901760, %v2792_v59 }
 0x5a7   : > { %v2803_v4 = vand.u32 4294901760, %v2802_v60  ;;  %v8409_v38 = vpack.c.bf16 %v3339_v34, %v3332_v37  ;;  %v3320_v39 = vsub.f32 %v3318_v32, %v3319_v35 }
 0x5a8   : > { %7809 = vmatprep.mubr.f32.mxu0 %v2793_v3 }
 0x5a9   : > { %7810 = vmatmul.mubr.f32.vlgmr.msra.gmra.mrb[4].mxu0 %v2803_v4  ;;  %v3321_v40 = vand.u32 4294901760, %v3320_v39 }
 0x5aa   : > { %8388 = vmatpush3.bf16.msra.mxu0 %v8385_v61  ;;  %7816 = vmatprep.mubr.f32.mxu0 %v2789_v57 }
 0x5ab   : > { %8390 = vmatprep.subr.bf16.mxu0 %v8389_v5 }
 0x5b1   : > { %7817 = vmatmul.mubr.f32.vlgmr.msra.gmra.mrb[4].mxu0 %v2799_v63 }
 0x5b2   : > { %8392 = vmatpush3.bf16.msra.mxu0 %v8389_v5  ;;  %7823 = vmatprep.mubr.f32.mxu0 %v2790_v62 }
 0x5b3   : > { %8394 = vmatprep.subr.bf16.mxu0 %v9431_v44 }
 0x5b9   : > { %7824 = vmatmul.mubr.f32.vlgmr.msra.gmra.mrb[4].mxu0 %v2800_v1 }
 0x5ba   : > { %8396 = vmatpush3.bf16.msra.mxu0 %v9431_v44  ;;  %7830 = vmatprep.mubr.f32.mxu0 %v2791_v0 }
 0x5bb   : > { %8398 = vmatprep.subr.bf16.mxu0 %v8397_v9 }
 0x5c1   : > { %7831 = vmatmul.mubr.f32.vlgmr.msra.gmra.mrb[4].mxu0 %v2801_v2 }
 0x5c2   : > { %8400 = vmatpush3.bf16.msra.mxu0 %v8397_v9  ;;  %7837 = vmatprep.mubr.f32.mxu0 %v2789_v57 }
 0x5c3   : > { %8402 = vmatprep.subr.bf16.mxu0 %v9431_v44 }
 0x5c9   : > { %7838 = vmatmul.mubr.f32.vlgmr.msra.gmra.mrb[4].mxu0 %v2799_v63 }
 0x5ca   : > { %8404 = vmatpush3.bf16.msra.mxu0 %v9431_v44  ;;  %7844 = vmatprep.mubr.f32.mxu0 %v2789_v57 }
 0x5cb   : > { %8406 = vmatprep.subr.bf16.mxu0 %v8405_v29 }
 0x5d1   : > { %7845 = vmatmul.mubr.f32.vlgmr.msra.gmra.mrb[4].mxu0 %v2799_v63 }
 0x5d2   : > { %7851 = vmatprep.mubr.f32.mxu0 %v3311_v36 }
 0x5d3   : > { %8408 = vmatpush3.bf16.xpose.msra.mxu0 %v8405_v29 }
 0x5d4   : > { %8410 = vmatprep.subr.bf16.mxu0 %v8409_v38 }
 0x5da   : > { %7852 = vmatmul.mubr.f32.vlgmr.msra.gmra.mrb[6].mxu0 %v3321_v40 }
 0x5db   : > { %8412 = vmatpush3.bf16.xpose.msra.mxu0 %v8409_v38  ;;  %7858 = vmatprep.mubr.f32.mxu0 %v3307_v16 }
 0x5dc   : > { %8414 = vmatprep.subr.bf16.mxu0 %v8413_v41 }
 0x5e2   : > { %7859 = vmatmul.mubr.f32.vlgmr.msra.gmra.mrb[6].mxu0 %v3317_v28 }
 0x5e3   : > { %8416 = vmatpush3.bf16.xpose.msra.mxu0 %v8413_v41  ;;  %7865 = vmatprep.mubr.f32.mxu0 %v3308_v20 }
 0x5e4   : > { %8418 = vmatprep.subr.bf16.mxu0 %v8405_v29 }
 0x5ea   : > { %7866 = vmatmul.mubr.f32.vlgmr.msra.gmra.mrb[6].mxu0 %v3318_v32 }
 0x5eb   : > { %8420 = vmatpush3.bf16.xpose.msra.mxu0 %v8405_v29  ;;  %7872 = vmatprep.mubr.f32.mxu0 %v3309_v27 }
 0x5ec   : > { %8422 = vmatprep.subr.bf16.mxu0 %v8421_v42 }
 0x5f2   : > { %7873 = vmatmul.mubr.f32.vlgmr.msra.gmra.mrb[6].mxu0 %v3319_v35 }
 0x5f3   : > { %8424 = vmatpush3.bf16.xpose.msra.mxu0 %v8421_v42  ;;  %7879 = vmatprep.mubr.f32.mxu0 %v3307_v16 }
 0x5f4   : > { %8426 = vmatprep.subr.bf16.mxu0 %v8405_v29 }
 0x5fa   : > { %7880 = vmatmul.mubr.f32.vlgmr.msra.gmra.mrb[6].mxu0 %v3317_v28 }
 0x5fb   : > { %8428 = vmatpush3.bf16.xpose.msra.mxu0 %v8405_v29  ;;  %7886 = vmatprep.mubr.f32.mxu0 %v3307_v16 }
 0x602   : > { %7887 = vmatmul.mubr.f32.vlgmr.msra.gmra.mrb[6].mxu0 %v3317_v28 }
 0x670   : > { %v9447_v43 = vpop.f32.mrb[2].mxu0 }
 0x671   : > { %v9449_v44 = vpop.f32.mrb[3].mxu0 }
 0x6a4   : > { %v9451_v45 = vpop.f32.mrb[4].mxu0 }
 0x6a5   : > { %v9453_v46 = vpop.f32.mrb[5].mxu0 }
 0x6d5   : > { %v7888_v47 = vpop.f32.mrb[6].mxu0 }
 0x6d6   : > { %v3743_v48 = vmul.f32 0.35355338, %v7888_v47  ;;  %v3732_v49 = vpop.f32.mrb[7].mxu0 }
 0x6d7   : > { %v3742_v50 = vmul.f32 0.35355338, %v3732_v49 }
 0x6d8   : > { %v3745_v51 = vsel %vm1107_vm6, %v3743_v48, -1e+09 }
 0x6d9   : > { %v3749_v52 = vsel %vm1629_vm7, %v3745_v51, -inf  ;;  %v3744_v53 = vsel %vm1106_vm8, %v3742_v50, -1e+09 }
 0x6da   : > { %3750 = vmax.xlane.f32.xlu1 %v3749_v52  ;;  %v3746_v54 = vsel %vm1629_vm7, %v3744_v53, -inf }
 0x6db   : > { %3747 = vmax.xlane.f32.xlu0 %v3746_v54 }
 0x6eb   : > { %3770 = vrot.lane.b32.xlu1 %v9361_v24, %s9087_s27 }
 0x6ef   : > { %4286 = vrot.lane.b32.xlu1 %v9363_v26, %s9088_s14 }
 0x6f3   : > { %4288 = vrot.lane.b32.xlu1 %v9361_v24, %s9088_s14  ;;  %s9789_s14 = sld [smem:[#allocation16_spill]] }
 0x6f7   : > { %4284 = vrot.lane.b32.xlu1 %v9361_v24, %s9089_s16 }
 0x6f9   : > { %p9791_p1 = scmp.ne.s32.totalorder %s9789_s14, 0 }
 0x767   : > { %v3751_v55 = vpop.xlane.xlu1 %3750 }
 0x768   : > { %v3753_v56 = vsub.f32 %v3745_v51, %v3751_v55  ;;  %v3748_v57 = vpop.xlane.xlu0 %3747 }
 0x769   : > { %v3752_v58 = vsub.f32 %v3744_v53, %v3748_v57 }
 0x76a   : > { %v3756_v61 = vmul.f32 1.442695, %v3753_v56 }
 0x76b   : > { %v3754_v62 = vmul.f32 1.442695, %v3752_v58  ;;  %v3771_v2 = vpop.permute.xlu1 %3770 }
 0x76c   : > { %8922 = vpow2.f32 %v3756_v61  ;;  %v3784_v60 = vand.u32 4294901760, %v3771_v2 }
 0x76d   : > { %8924 = vpow2.f32 %v3754_v62 }
 0x76e   : > { %v3876_v5 = vsub.f32 %v3771_v2, %v3784_v60 }
 0x76f   : > { %v4287_v38 = vpop.permute.xlu1 %4286 }
 0x770   : > { %v3877_v8 = vand.u32 4294901760, %v3876_v5  ;;  %v4294_v47 = vsel %vm1114_vm5, %v4287_v38, 0 }
 0x771   : > { %v4299_v50 = vand.u32 4294901760, %v4294_v47 }
 0x772   : > { %v3878_v6 = vsub.f32 %v3876_v5, %v3877_v8 }
 0x773   : > { %v4289_v39 = vpop.permute.xlu1 %4288  ;;  %v4387_v54 = vsub.f32 %v4294_v47, %v4299_v50 }
 0x774   : > { %v3879_v21 = vand.u32 4294901760, %v3878_v6  ;;  %v4296_v42 = vsel %vm1114_vm5, %v4289_v39, 0 }
 0x775   : > { %v4302_v49 = vand.u32 4294901760, %v4296_v42  ;;  %v4388_v58 = vand.u32 4294901760, %v4387_v54 }
 0x776   : > { %v8923_v63 = vpop.eup %8922 }
 0x777   : > { %v3761_v0 = vsel %vm1629_vm7, %v8923_v63, 0.0  ;;  %v8925_v1 = vpop.eup %8924  ;;  %v4394_v52 = vsub.f32 %v4296_v42, %v4302_v49  ;;  %v4285_v53 = vpop.permute.xlu1 %4284 }
 0x778   : > { %3762 = vadd.xlane.f32.xlu0 %v3761_v0  ;;  %v3758_v59 = vsel %vm1629_vm7, %v8925_v1, 0.0  ;;  %v4292_v56 = vsel %vm1114_vm5, %v4285_v53, 0 }
 0x779   : > { %v4395_v57 = vand.u32 4294901760, %v4394_v52  ;;  %v4375_v61 = vand.u32 4294901760, %v4292_v56 }
 0x77b   : > { %v4396_v0 = vsub.f32 %v4394_v52, %v4395_v57 }
 0x77c   : > { %3759 = vadd.xlane.f32.xlu0 %v3758_v59  ;;  %v4376_v59 = vsub.f32 %v4292_v56, %v4375_v61 }
 0x792   : > { %3768 = vrot.lane.b32.xlu0 %v9363_v26, %s9087_s27  ;;  %s9093_s27 = smov 24  }
 0x796   : > { %4282 = vrot.lane.b32.xlu0 %v9363_v26, %s9089_s16  ;;  %s7252_s16 = sshll.u32 %s9192_s17, 8  ;;  %s9703_s17 = scalar_lea.sflag [#allocation4], %s488_s21 }
 0x797   : > { %s9696_s29 = scalar_lea.hbm %s9790_s22, %s7252_s16 }
 0x805   : > { %v3763_v3 = vpop.xlane.xlu0 %3762 }
 0x806   : > { %8926 = vrcp.f32 %v3763_v3  ;;  %v4397_v3 = vand.u32 4294901760, %v4396_v0 }
 0x809   : > { %v3760_v4 = vpop.xlane.xlu0 %3759 }
 0x80a   : > { %8928 = vrcp.f32 %v3760_v4 }
 0x80d   : > { %v3769_v7 = vpop.permute.xlu0 %3768 }
 0x80e   : > { %v3781_v9 = vand.u32 4294901760, %v3769_v7 }
 0x810   : > { %v8927_v11 = vpop.eup %8926  ;;  %v9469_v12 = vpack.c.bf16 %v3784_v60, %v3781_v9  ;;  %v3869_v13 = vsub.f32 %v3769_v7, %v3781_v9  ;;  %v4377_v60 = vand.u32 4294901760, %v4376_v59 }
 0x811   : > { %v3767_v14 = vmul.f32 %v8927_v11, %v8923_v63  ;;  %v4283_v41 = vpop.permute.xlu0 %4282  ;;  %v8453_v63 = vpack.c.bf16 %v4302_v49, %v4299_v50  ;;  %v8461_v11 = vpack.c.bf16 %v4394_v52, %v4387_v54 }
 0x812   : > { %v3870_v15 = vand.u32 4294901760, %v3869_v13  ;;  %8430 = vmatprep.subr.bf16.mxu1 %v9469_v12  ;;  %v8437_v37 = vpack.c.bf16 %v3876_v5, %v3869_v13  ;;  %v4290_v48 = vsel %vm1114_vm5, %v4283_v41, 0 }
 0x813   : > { %8432 = vmatpush3.bf16.msra.mxu1 %v9469_v12  ;;  %v3778_v16 = vsel %vm1629_vm7, %v3767_v14, 0  ;;  %v4365_v51 = vand.u32 4294901760, %v4290_v48 }
 0x814   : > { %v8929_v17 = vpop.eup %8928  ;;  %v3871_v18 = vsub.f32 %v3869_v13, %v3870_v15  ;;  %v9474_v19 = vand.u32 4294901760, %v3778_v16  ;;  %v8445_v40 = vpack.c.bf16 %v3877_v8, %v3870_v15  ;;  %v4378_v8 = vsub.f32 %v4376_v59, %v4377_v60 }
 0x815   : > { %v3765_v20 = vmul.f32 %v8929_v17, %v8925_v1  ;;  %v4366_v55 = vsub.f32 %v4290_v48, %v4365_v51  ;;  %v4389_v1 = vsub.f32 %v4387_v54, %v4388_v58 }
 0x816   : > { %v3872_v10 = vand.u32 4294901760, %v3871_v18  ;;  %v3858_v25 = vsub.f32 %v3778_v16, %v9474_v19  ;;  %v4379_v9 = vand.u32 4294901760, %v4378_v8 }
 0x817   : > { %v3775_v27 = vsel %vm1629_vm7, %v3765_v20, 0  ;;  %v4367_v62 = vand.u32 4294901760, %v4366_v55  ;;  %v4390_v5 = vand.u32 4294901760, %v4389_v1 }
 0x818   : > { %v8433_v28 = vpack.c.bf16 %v3879_v21, %v3872_v10  ;;  %v3847_v29 = vand.u32 4294901760, %v3775_v27  ;;  %v3859_v30 = vand.u32 4294901760, %v3858_v25 }
 0x819   : > { %v4368_v2 = vsub.f32 %v4366_v55, %v4367_v62  ;;  %v8457_v7 = vpack.c.bf16 %v4397_v3, %v4390_v5 }
 0x81a   : > { %8434 = vmatprep.subr.bf16.mxu1 %v8433_v28  ;;  %v3848_v31 = vsub.f32 %v3775_v27, %v3847_v29  ;;  %v3860_v33 = vsub.f32 %v3858_v25, %v3859_v30 }
 0x81b   : > { %v4369_v4 = vand.u32 4294901760, %v4368_v2 }
 0x81c   : > { %v3849_v32 = vand.u32 4294901760, %v3848_v31  ;;  %v3861_v36 = vand.u32 4294901760, %v3860_v33 }
 0x81e   : > { %v3850_v34 = vsub.f32 %v3848_v31, %v3849_v32 }
 0x820   : > { %v3851_v35 = vand.u32 4294901760, %v3850_v34 }
 0x822   : > { %7893 = vmatprep.mubr.f32.mxu1 %v3851_v35 }
 0x823   : > { %7894 = vmatmul.mubr.f32.vlgmr.msra.gmra.mrb[4].mxu1 %v3861_v36 }
 0x824   : > { %8436 = vmatpush3.bf16.msra.mxu1 %v8433_v28  ;;  %7900 = vmatprep.mubr.f32.mxu1 %v3847_v29 }
 0x825   : > { %8438 = vmatprep.subr.bf16.mxu1 %v8437_v37 }
 0x82b   : > { %7901 = vmatmul.mubr.f32.vlgmr.msra.gmra.mrb[4].mxu1 %v9474_v19 }
 0x82c   : > { %8440 = vmatpush3.bf16.msra.mxu1 %v8437_v37  ;;  %7907 = vmatprep.mubr.f32.mxu1 %v3848_v31 }
 0x82d   : > { %8442 = vmatprep.subr.bf16.mxu1 %v9469_v12 }
 0x833   : > { %7908 = vmatmul.mubr.f32.vlgmr.msra.gmra.mrb[4].mxu1 %v3858_v25 }
 0x834   : > { %8444 = vmatpush3.bf16.msra.mxu1 %v9469_v12  ;;  %7914 = vmatprep.mubr.f32.mxu1 %v3849_v32 }
 0x835   : > { %8446 = vmatprep.subr.bf16.mxu1 %v8445_v40 }
 0x83b   : > { %7915 = vmatmul.mubr.f32.vlgmr.msra.gmra.mrb[4].mxu1 %v3859_v30 }
 0x83c   : > { %8448 = vmatpush3.bf16.msra.mxu1 %v8445_v40  ;;  %7921 = vmatprep.mubr.f32.mxu1 %v3847_v29 }
 0x83d   : > { %8450 = vmatprep.subr.bf16.mxu1 %v9469_v12 }
 0x843   : > { %7922 = vmatmul.mubr.f32.vlgmr.msra.gmra.mrb[4].mxu1 %v9474_v19 }
 0x844   : > { %8452 = vmatpush3.bf16.msra.mxu1 %v9469_v12  ;;  %7928 = vmatprep.mubr.f32.mxu1 %v3847_v29  ;;  %v8469_v12 = vpack.c.bf16 %v4395_v57, %v4388_v58 }
 0x845   : > { %8454 = vmatprep.subr.bf16.mxu1 %v8453_v63 }
 0x84b   : > { %7929 = vmatmul.mubr.f32.vlgmr.msra.gmra.mrb[4].mxu1 %v9474_v19 }
 0x84c   : > { %7935 = vmatprep.mubr.f32.mxu1 %v4369_v4  ;;  %v5372_v4 = vld [vmem:[%s9751_s6 + $0x8] sm:$0xff] }
 0x84d   : > { %8456 = vmatpush3.bf16.xpose.msra.mxu1 %v8453_v63 }
 0x84e   : > { %8458 = vmatprep.subr.bf16.mxu1 %v8457_v7 }
 0x854   : > { %7936 = vmatmul.mubr.f32.vlgmr.msra.gmra.mrb[6].mxu1 %v4379_v9 }
 0x855   : > { %8460 = vmatpush3.bf16.xpose.msra.mxu1 %v8457_v7  ;;  %7942 = vmatprep.mubr.f32.mxu1 %v4365_v51  ;;  %v5392_v7 = vand.u32 4294901760, %v5372_v4 }
 0x856   : > { %8462 = vmatprep.subr.bf16.mxu1 %v8461_v11 }
 0x85c   : > { %7943 = vmatmul.mubr.f32.vlgmr.msra.gmra.mrb[6].mxu1 %v4375_v61 }
 0x85d   : > { %8464 = vmatpush3.bf16.xpose.msra.mxu1 %v8461_v11  ;;  %7949 = vmatprep.mubr.f32.mxu1 %v4366_v55  ;;  %v5486_v11 = vsub.f32 %v5372_v4, %v5392_v7  ;;  %v8947_v4 = vld [vmem:[%s9296_s19] sm:$0xff] }
 0x85e   : > { %8466 = vmatprep.subr.bf16.mxu1 %v8453_v63 }
 0x864   : > { %7950 = vmatmul.mubr.f32.vlgmr.msra.gmra.mrb[6].mxu1 %v4376_v59 }
 0x865   : > { %8468 = vmatpush3.bf16.xpose.msra.mxu1 %v8453_v63  ;;  %7956 = vmatprep.mubr.f32.mxu1 %v4367_v62 }
 0x866   : > { %8470 = vmatprep.subr.bf16.mxu1 %v8469_v12 }
 0x86c   : > { %7957 = vmatmul.mubr.f32.vlgmr.msra.gmra.mrb[6].mxu1 %v4377_v60  ;;  %v5371_v60 = vld [vmem:[%s9751_s6] sm:$0xff] }
 0x86d   : > { %8472 = vmatpush3.bf16.xpose.msra.mxu1 %v8469_v12  ;;  %7963 = vmatprep.mubr.f32.mxu1 %v4365_v51  ;;  %v5389_v5 = vand.u32 4294901760, %v5371_v60  ;;  %v5373_v12 = vld [vmem:[%s9751_s6 + $0x10] sm:$0xff] }
 0x86e   : > { %8474 = vmatprep.subr.bf16.mxu1 %v8453_v63 }
 0x86f   : > { %v9511_v8 = vpack.c.bf16 %v5392_v7, %v5389_v5  ;;  %v5479_v9 = vsub.f32 %v5371_v60, %v5389_v5 }
 0x874   : > { %7964 = vmatmul.mubr.f32.vlgmr.msra.gmra.mrb[6].mxu1 %v4375_v61 }
 0x875   : > { %8476 = vmatpush3.bf16.xpose.msra.mxu1 %v8453_v63  ;;  %7970 = vmatprep.mubr.f32.mxu1 %v4365_v51 }
 0x87c   : > { %7971 = vmatmul.mubr.f32.vlgmr.msra.gmra.mrb[6].mxu1 %v4375_v61 }
 0x91e   : > { %v7930_v13 = vpop.f32.mrb[4].mxu1 }
 0x91f   : > { %v4272_v14 = vpop.f32.mrb[5].mxu1 }
 0x94f   : > { %v7972_v6 = vpop.f32.mrb[6].mxu1 }
 0x950   : > { %v4801_v15 = vmul.f32 0.35355338, %v7972_v6  ;;  %v4790_v16 = vpop.f32.mrb[7].mxu1 }
 0x951   : > { %v4800_v17 = vmul.f32 0.35355338, %v4790_v16  ;;  %v5487_v16 = vand.u32 4294901760, %v5486_v11 }
 0x952   : > { %v4803_v18 = vsel %vm1107_vm6, %v4801_v15, -1e+09  ;;  %v5480_v15 = vand.u32 4294901760, %v5479_v9 }
 0x953   : > { %v4807_v19 = vsel %vm1629_vm7, %v4803_v18, -inf  ;;  %v4802_v20 = vsel %vm1106_vm8, %v4800_v17, -1e+09 }
 0x954   : > { %4808 = vmax.xlane.f32.xlu1 %v4807_v19  ;;  %v4804_v10 = vsel %vm1629_vm7, %v4802_v20, -inf  ;;  %v5488_v19 = vsub.f32 %v5486_v11, %v5487_v16 }
 0x955   : > { %4805 = vmax.xlane.f32.xlu0 %v4804_v10 }
 0x965   : > { %4828 = vrot.lane.b32.xlu1 %v9361_v24, %s9090_s23 }
 0x969   : > { %5342 = vrot.lane.b32.xlu1 %v9453_v46, %s9091_s28 }
 0x96d   : > { %5344 = vrot.lane.b32.xlu1 %v9451_v45, %s9091_s28 }
 0x971   : > { %5352 = vrot.lane.b32.xlu1 %v7930_v13, %s9092_s20  ;;  %v5374_v13 = vld [vmem:[%s9751_s6 + $0x18] sm:$0xff] }
 0x972   : > { %v5398_v6 = vand.u32 4294901760, %v5374_v13 }
 0x974   : > { %v5500_v10 = vsub.f32 %v5374_v13, %v5398_v6 }
 0x9e1   : > { %v4809_v22 = vpop.xlane.xlu1 %4808 }
 0x9e2   : > { %v4811_v21 = vsub.f32 %v4803_v18, %v4809_v22  ;;  %v4806_v23 = vpop.xlane.xlu0 %4805  ;;  %v5481_v18 = vsub.f32 %v5479_v9, %v5480_v15 }
 0x9e3   : > { %v4810_v25 = vsub.f32 %v4802_v20, %v4806_v23 }
 0x9e4   : > { %v4814_v27 = vmul.f32 1.442695, %v4811_v21  ;;  %v5482_v22 = vand.u32 4294901760, %v5481_v18  ;;  %v5489_v21 = vand.u32 4294901760, %v5488_v19  ;;  %v5976_v19 = vld [vmem:[#allocation5] sm:$0xff] }
 0x9e5   : > { %v4812_v28 = vmul.f32 1.442695, %v4810_v25  ;;  %v4829_v45 = vpop.permute.xlu1 %4828 }
 0x9e6   : > { %8930 = vpow2.f32 %v4814_v27  ;;  %v4842_v32 = vand.u32 4294901760, %v4829_v45  ;;  %v5501_v27 = vand.u32 4294901760, %v5500_v10 }
 0x9e7   : > { %8932 = vpow2.f32 %v4812_v28 }
 0x9e8   : > { %v4934_v34 = vsub.f32 %v4829_v45, %v4842_v32 }
 0x9ea   : > { %v4935_v36 = vand.u32 4294901760, %v4934_v34 }
 0x9ec   : > { %v4936_v42 = vsub.f32 %v4934_v34, %v4935_v36 }
 0x9ee   : > { %v4937_v53 = vand.u32 4294901760, %v4936_v42 }
 0x9f0   : > { %v8931_v29 = vpop.eup %8930 }
 0x9f1   : > { %v4819_v24 = vsel %vm1629_vm7, %v8931_v29, 0.0  ;;  %v8933_v30 = vpop.eup %8932 }
 0x9f2   : > { %4820 = vadd.xlane.f32.xlu0 %v4819_v24  ;;  %v4816_v46 = vsel %vm1629_vm7, %v8933_v30, 0.0 }
 0x9f6   : > { %4817 = vadd.xlane.f32.xlu0 %v4816_v46 }
 0xa0c   : > { %4826 = vrot.lane.b32.xlu0 %v9363_v26, %s9090_s23 }
 0xa10   : > { %5350 = vrot.lane.b32.xlu0 %v4272_v14, %s9092_s20  ;;  %v5395_v14 = vand.u32 4294901760, %v5373_v12 }
 0xa12   : > { %v9521_v17 = vpack.c.bf16 %v5398_v6, %v5395_v14  ;;  %v5493_v20 = vsub.f32 %v5373_v12, %v5395_v14 }
 0xa14   : > { %v5494_v23 = vand.u32 4294901760, %v5493_v20 }
 0xa16   : > { %v5495_v24 = vsub.f32 %v5493_v20, %v5494_v23 }
 0xa18   : > { %v5496_v46 = vand.u32 4294901760, %v5495_v24 }
 0xa7f   : > { %v4821_v31 = vpop.xlane.xlu0 %4820 }
 0xa80   : > { %8934 = vrcp.f32 %v4821_v31 }
 0xa83   : > { %v4818_v33 = vpop.xlane.xlu0 %4817 }
 0xa84   : > { %8936 = vrcp.f32 %v4818_v33  ;;  %v8521_v33 = vpack.c.bf16 %v5500_v10, %v5493_v20  ;;  %v5977_v20 = vld [vmem:[#allocation5 + $0x8] sm:$0xff] }
 0xa87   : > { %v4827_v35 = vpop.permute.xlu0 %4826 }
 0xa88   : > { %v4839_v37 = vand.u32 4294901760, %v4827_v35 }
 0xa8a   : > { %v8935_v38 = vpop.eup %8934  ;;  %v8477_v39 = vpack.c.bf16 %v4842_v32, %v4839_v37  ;;  %v4927_v40 = vsub.f32 %v4827_v35, %v4839_v37  ;;  %v8517_v32 = vpack.c.bf16 %v5486_v11, %v5479_v9  ;;  %v8537_v35 = vpack.c.bf16 %v5501_v27, %v5494_v23  ;;  %v5979_v23 = vld [vmem:[#allocation5 + $0x18] sm:$0xff] }
 0xa8b   : > { %v4825_v41 = vmul.f32 %v8935_v38, %v8931_v29  ;;  %v8509_v29 = vpack.c.bf16 %v5489_v21, %v5482_v22  ;;  %v5994_v22 = vand.u32 4294901760, %v5976_v19  ;;  %v5997_v21 = vand.u32 4294901760, %v5977_v20 }
 0xa8c   : > { %v4928_v47 = vand.u32 4294901760, %v4927_v40  ;;  %8478 = vmatprep.subr.bf16.mxu0 %v8477_v39  ;;  %v8485_v2 = vpack.c.bf16 %v4934_v34, %v4927_v40  ;;  %v8533_v34 = vpack.c.bf16 %v5487_v16, %v5480_v15 }
 0xa8d   : > { %8480 = vmatpush3.bf16.msra.mxu0 %v8477_v39  ;;  %v4836_v26 = vsel %vm1629_vm7, %v4825_v41, 0  ;;  %v6084_v24 = vsub.f32 %v5976_v19, %v5994_v22 }
 0xa8e   : > { %v8937_v48 = vpop.eup %8936  ;;  %v4929_v49 = vsub.f32 %v4927_v40, %v4928_v47  ;;  %v4915_v50 = vand.u32 4294901760, %v4836_v26  ;;  %v8493_v3 = vpack.c.bf16 %v4935_v36, %v4928_v47  ;;  %v5343_v36 = vpop.permute.xlu1 %5342 }
 0xa8f   : > { %v4823_v51 = vmul.f32 %v8937_v48, %v8933_v30  ;;  %v5502_v30 = vsub.f32 %v5500_v10, %v5501_v27  ;;  %v5364_v41 = vsel %vm1114_vm5, %v9449_v44, %v5343_v36  ;;  %v5978_v10 = vld [vmem:[#allocation5 + $0x10] sm:$0xff]  ;;  %v6003_v27 = vand.u32 4294901760, %v5979_v23 }
 0xa90   : > { %v4930_v52 = vand.u32 4294901760, %v4929_v49  ;;  %v4916_v54 = vsub.f32 %v4836_v26, %v4915_v50 }
 0xa91   : > { %v4833_v55 = vsel %vm1629_vm7, %v4823_v51, 0  ;;  %v5503_v45 = vand.u32 4294901760, %v5502_v30  ;;  %v6091_v30 = vsub.f32 %v5977_v20, %v5997_v21 }
 0xa92   : > { %v8481_v56 = vpack.c.bf16 %v4937_v53, %v4930_v52  ;;  %v4905_v57 = vand.u32 4294901760, %v4833_v55  ;;  %v4917_v58 = vand.u32 4294901760, %v4916_v54  ;;  %v5345_v37 = vpop.permute.xlu1 %5344 }
 0xa93   : > { %v8513_v31 = vpack.c.bf16 %v5503_v45, %v5496_v46  ;;  %v5365_v40 = vsel %vm1114_vm5, %v9447_v43, %v5345_v37  ;;  %v6085_v46 = vand.u32 4294901760, %v6084_v24  ;;  %v6092_v45 = vand.u32 4294901760, %v6091_v30 }
 0xa94   : > { %8482 = vmatprep.subr.bf16.mxu0 %v8481_v56  ;;  %v4906_v61 = vsub.f32 %v4833_v55, %v4905_v57  ;;  %v4918_v63 = vsub.f32 %v4916_v54, %v4917_v58 }
 0xa96   : > { %v4907_v62 = vand.u32 4294901760, %v4906_v61  ;;  %v4919_v59 = vand.u32 4294901760, %v4918_v63  ;;  %v5353_v38 = vpop.permute.xlu1 %5352  ;;  %v7241_v63 = vld [vmem:[%s9752_s7] ss:$0 sm:$0xff] }
 0xa97   : > { %v5367_v42 = vsel %vm1629_vm7, %v5365_v40, %v5353_v38 }
 0xa98   : > { %v4908_v0 = vsub.f32 %v4906_v61, %v4907_v62 }
 0xa9a   : > { %v4909_v1 = vand.u32 4294901760, %v4908_v0 }
 0xa9c   : > { %7977 = vmatprep.mubr.f32.mxu0 %v4909_v1 }
 0xa9d   : > { %7978 = vmatmul.mubr.f32.vlgmr.msra.gmra.mrb[8].mxu0 %v4919_v59 }
 0xa9e   : > { %8484 = vmatpush3.bf16.msra.mxu0 %v8481_v56  ;;  %7984 = vmatprep.mubr.f32.mxu0 %v4905_v57 }
 0xa9f   : > { %8486 = vmatprep.subr.bf16.mxu0 %v8485_v2 }
 0xaa5   : > { %7985 = vmatmul.mubr.f32.vlgmr.msra.gmra.mrb[8].mxu0 %v4915_v50 }
 0xaa6   : > { %8488 = vmatpush3.bf16.msra.mxu0 %v8485_v2  ;;  %7991 = vmatprep.mubr.f32.mxu0 %v4906_v61 }
 0xaa7   : > { %8490 = vmatprep.subr.bf16.mxu0 %v8477_v39 }
 0xaad   : > { %7992 = vmatmul.mubr.f32.vlgmr.msra.gmra.mrb[8].mxu0 %v4916_v54 }
 0xaae   : > { %8492 = vmatpush3.bf16.msra.mxu0 %v8477_v39  ;;  %7998 = vmatprep.mubr.f32.mxu0 %v4907_v62 }
 0xaaf   : > { %8494 = vmatprep.subr.bf16.mxu0 %v8493_v3 }
 0xab5   : > { %7999 = vmatmul.mubr.f32.vlgmr.msra.gmra.mrb[8].mxu0 %v4917_v58 }
 0xab6   : > { %8496 = vmatpush3.bf16.msra.mxu0 %v8493_v3  ;;  %8005 = vmatprep.mubr.f32.mxu0 %v4905_v57  ;;  %v8946_v3 = vld [vmem:[%s9296_s19 + $0x8] sm:$0xff]  ;;  %s490_s19 = scalar_lea.vmem [#allocation7], %s7235_s26  ;;  %s9008_s26 = sshll.u32 %s9094_s24, 4  ;;  %s9009_s26 = int_to_ptr.vmem [resolvable:$false] %s9008_s26 }
 0xab7   : > { %8498 = vmatprep.subr.bf16.mxu0 %v8477_v39  ;;  %s7143_s23 = sshll.u32 %s490_s19, 4  ;;  %s9010_s18 = scalar_lea.vmem %s9009_s26, 512  ;;  %s9699_s23 = int_to_ptr.vmem [resolvable:$true] %s7143_s23 }
 0xab8   : > { %s9004_s15 = scalar_lea.vmem %s9699_s23, 256  ;;  %p9011_p4 = scmp.lt.s32.totalorder %s9699_s23, %s9009_s26 }
 0xab9   : > { %p9005_p12 = scmp.ne.s32.totalorder %s9699_s23, %s9004_s15  ;;  %p9012_p7 = scmp.lt.s32.totalorder %s9010_s18, %s9004_s15 }
 0xabb   : > { %p9006_p2 = pnand %p9005_p12, %p9791_p1  ;;  %p9013_p8 = por %p9012_p7, %p9011_p4 }
 0xabd   : > { %8006 = vmatmul.mubr.f32.vlgmr.msra.gmra.mrb[8].mxu0 %v4915_v50  ;;  %p9007_p3 = pneg %p9006_p2 }
 0xabe   : > { %8500 = vmatpush3.bf16.msra.mxu0 %v8477_v39  ;;  %8012 = vmatprep.mubr.f32.mxu0 %v4905_v57  ;;  %v5351_v39 = vpop.permute.xlu0 %5350 }
 0xabf   : > { %8502 = vmatprep.subr.bf16.mxu0 %v9511_v8  ;;  %v5366_v26 = vsel %vm1629_vm7, %v5364_v41, %v5351_v39  ;;  %p9014_p11 = pnand %p9013_p8, %p9007_p3 }
 0xac5   : > { %8013 = vmatmul.mubr.f32.vlgmr.msra.gmra.mrb[8].mxu0 %v4915_v50 }
 0xac6   : > { %8504 = vmatpush3.bf16.msra.mxu0 %v9511_v8 }
 0xac7   : > { %8506 = vmatprep.subr.bf16.mxu0 %v9521_v17 }
 0xaca   : > { %8508 = vmatpush3.bf16.msra.mxu0 %v9521_v17 }
 0xacb   : > { %8510 = vmatprep.subr.bf16.mxu0 %v8509_v29 }
 0xb98   : > { %v8014_v25 = vpop.f32.mrb[8].mxu0 }
 0xb99   : > { %5360 = vrot.lane.b32.xlu1 %v8014_v25, %s9093_s27  ;;  %v5330_v28 = vpop.f32.mrb[9].mxu0  ;;  %v6000_v25 = vand.u32 4294901760, %v5978_v10 }
 0xb9a   : > { %5358 = vrot.lane.b32.xlu0 %v5330_v28, %s9093_s27  ;;  %v9566_v28 = vpack.c.bf16 %v5997_v21, %v5994_v22 }
 0xb9c   : > { %8550 = vmatprep.subr.bf16.mxu1 %v9566_v28 }
 0xb9d   : > { %8552 = vmatpush3.bf16.msra.mxu1 %v9566_v28 }
 0xc0b   : > { %v5361_v47 = vpop.permute.xlu1 %5360 }
 0xc0c   : > { %v5370_v48 = vsel %vm5368_vm9, %v5367_v42, %v5361_v47  ;;  %v5359_v49 = vpop.permute.xlu0 %5358 }
 0xc0d   : > { %v5386_v50 = vsel %vm498_vm0, %v5370_v48, 0  ;;  %v5369_v51 = vsel %vm5368_vm9, %v5366_v26, %v5359_v49  ;;  %v9577_v48 = vpack.c.bf16 %v6091_v30, %v6084_v24 }
 0xc0e   : > { %v5467_v52 = vand.u32 4294901760, %v5386_v50  ;;  %v5383_v53 = vsel %vm498_vm0, %v5369_v51, 0 }
 0xc0f   : > { %v5457_v54 = vand.u32 4294901760, %v5383_v53 }
 0xc10   : > { %v5468_v55 = vsub.f32 %v5386_v50, %v5467_v52  ;;  %v9581_v50 = vpack.c.bf16 %v6092_v45, %v6085_v46 }
 0xc11   : > { %v5458_v56 = vsub.f32 %v5383_v53, %v5457_v54  ;;  %v9593_v53 = vld [vmem:[%s9757_s12 + $0x8] sm:$0xff] }
 0xc12   : > { %v5469_v43 = vand.u32 4294901760, %v5468_v55 }
 0xc13   : > { %v5459_v57 = vand.u32 4294901760, %v5458_v56 }
 0xc14   : > { %v5470_v58 = vsub.f32 %v5468_v55, %v5469_v43 }
 0xc15   : > { %v5460_v44 = vsub.f32 %v5458_v56, %v5459_v57 }
 0xc16   : > { %v5471_v62 = vand.u32 4294901760, %v5470_v58 }
 0xc17   : > { %v5461_v61 = vand.u32 4294901760, %v5460_v44 }
 0xc19   : > { %8023 = vmatprep.mubr.f32.mxu0 %v5461_v61 }
 0xc1a   : > { %8024 = vmatmul.mubr.f32.vlgmr.msra.gmra.mrb[10].mxu0 %v5471_v62 }
 0xc1b   : > { %8512 = vmatpush3.bf16.msra.mxu0 %v8509_v29  ;;  %8034 = vmatprep.mubr.f32.mxu0 %v5457_v54  ;;  %v9568_v29 = vpack.c.bf16 %v6003_v27, %v6000_v25 }
 0xc1c   : > { %8514 = vmatprep.subr.bf16.mxu0 %v8513_v31 }
 0xc1d   : > { %8554 = vmatprep.subr.bf16.mxu1 %v9568_v29 }
 0xc1e   : > { %8556 = vmatpush3.bf16.msra.mxu1 %v9568_v29 }
 0xc1f   : > { %8516 = vmatpush3.bf16.msra.mxu0 %v8513_v31  ;;  %v6086_v31 = vsub.f32 %v6084_v24, %v6085_v46 }
 0xc20   : > { %8518 = vmatprep.subr.bf16.mxu0 %v8517_v32 }
 0xc22   : > { %8035 = vmatmul.mubr.f32.vlgmr.msra.gmra.mrb[10].mxu0 %v5467_v52 }
 0xc23   : > { %8520 = vmatpush3.bf16.msra.mxu0 %v8517_v32  ;;  %8045 = vmatprep.mubr.f32.mxu0 %v5458_v56  ;;  %v6093_v32 = vsub.f32 %v6091_v30, %v6092_v45 }
 0xc24   : > { %8522 = vmatprep.subr.bf16.mxu0 %v8521_v33 }
 0xc25   : > { %v6094_v36 = vand.u32 4294901760, %v6093_v32 }
 0xc27   : > { %8524 = vmatpush3.bf16.msra.mxu0 %v8521_v33  ;;  %v6098_v33 = vsub.f32 %v5978_v10, %v6000_v25 }
 0xc28   : > { %8526 = vmatprep.subr.bf16.mxu0 %v9511_v8 }
 0xc29   : > { %v6099_v37 = vand.u32 4294901760, %v6098_v33 }
 0xc2a   : > { %8046 = vmatmul.mubr.f32.vlgmr.msra.gmra.mrb[10].mxu0 %v5468_v55  ;;  %v6549_v55 = vand.u32 4294901760, %v9593_v53 }
 0xc2b   : > { %8528 = vmatpush3.bf16.msra.mxu0 %v9511_v8  ;;  %8056 = vmatprep.mubr.f32.mxu0 %v5459_v57  ;;  %v6100_v40 = vsub.f32 %v6098_v33, %v6099_v37 }
 0xc2c   : > { %8530 = vmatprep.subr.bf16.mxu0 %v9521_v17 }
 0xc2d   : > { %v6101_v42 = vand.u32 4294901760, %v6100_v40  ;;  %v6529_v40 = vld [vmem:[%s9757_s12 + $0x30] sm:$0xff] }
 0xc2f   : > { %8532 = vmatpush3.bf16.msra.mxu0 %v9521_v17 }
 0xc30   : > { %8534 = vmatprep.subr.bf16.mxu0 %v8533_v34 }
 0xc32   : > { %8057 = vmatmul.mubr.f32.vlgmr.msra.gmra.mrb[10].mxu0 %v5469_v43 }
 0xc33   : > { %8536 = vmatpush3.bf16.msra.mxu0 %v8533_v34  ;;  %8067 = vmatprep.mubr.f32.mxu0 %v5457_v54  ;;  %v6105_v34 = vsub.f32 %v5979_v23, %v6003_v27 }
 0xc34   : > { %8538 = vmatprep.subr.bf16.mxu0 %v8537_v35 }
 0xc35   : > { %v6106_v38 = vand.u32 4294901760, %v6105_v34  ;;  %v9579_v49 = vpack.c.bf16 %v6105_v34, %v6098_v33  ;;  %v6526_v33 = vld [vmem:[%s9757_s12 + $0x18] sm:$0xff] }
 0xc37   : > { %8540 = vmatpush3.bf16.msra.mxu0 %v8537_v35  ;;  %v6087_v35 = vand.u32 4294901760, %v6086_v31  ;;  %v6107_v41 = vsub.f32 %v6105_v34, %v6106_v38  ;;  %v9583_v51 = vpack.c.bf16 %v6106_v38, %v6099_v37 }
 0xc38   : > { %8542 = vmatprep.subr.bf16.mxu0 %v9511_v8 }
 0xc39   : > { %v9574_v39 = vpack.c.bf16 %v6094_v36, %v6087_v35  ;;  %v6108_v47 = vand.u32 4294901760, %v6107_v41  ;;  %v6528_v36 = vld [vmem:[%s9757_s12 + $0x28] sm:$0xff]  ;;  %v6530_v41 = vld [vmem:[%s9757_s12 + $0x38] sm:$0xff] }
 0xc3a   : > { %8068 = vmatmul.mubr.f32.vlgmr.msra.gmra.mrb[10].mxu0 %v5467_v52  ;;  %v6561_v38 = vand.u32 4294901760, %v6528_v36 }
 0xc3b   : > { %8544 = vmatpush3.bf16.msra.mxu0 %v9511_v8  ;;  %8078 = vmatprep.mubr.f32.mxu0 %v5457_v54  ;;  %v8561_v26 = vpack.c.bf16 %v6108_v47, %v6101_v42  ;;  %v6564_v42 = vand.u32 4294901760, %v6529_v40  ;;  %v6567_v47 = vand.u32 4294901760, %v6530_v41 }
 0xc3c   : > { %8546 = vmatprep.subr.bf16.mxu0 %v9521_v17  ;;  %8558 = vmatprep.subr.bf16.mxu1 %v9574_v39 }
 0xc3f   : > { %8548 = vmatpush3.bf16.msra.mxu0 %v9521_v17 }
 0xc42   : > { %8079 = vmatmul.mubr.f32.vlgmr.msra.gmra.mrb[10].mxu0 %v5467_v52  ;;  %v9588_v52 = vld [vmem:[%s9757_s12] sm:$0xff] }
 0xc43   : > { %v6546_v54 = vand.u32 4294901760, %v9588_v52 }
 0xc45   : > { %v9601_v56 = vpack.c.bf16 %v6549_v55, %v6546_v54 }
 0xc47   : > { %8646 = vmatprep.subr.bf16.mxu0 %v9601_v56 }
 0xc48   : > { %8648 = vmatpush3.bf16.msra.mxu0 %v9601_v56 }
 0xd15   : > { %v8080_v0 = vpop.f32.mrb[10].mxu0 }
 0xd16   : > { %v8695_v1 = vadd.f32 %v8080_v0, %v7241_v63  ;;  %v5906_v59 = vpop.f32.mrb[11].mxu0 }
 0xd17   : > { %v8696_v2 = vadd.f32 %v7241_v63, %v5906_v59 }
 0xd18   : > { %v9545_v60 = vadd.f32 %v8946_v3, %v8695_v1 }
 0xd19   : > { %v9548_v5 = vadd.f32 %v8947_v4, %v8696_v2 }
 0xd1a   : > { %v5921_v7 = vsel %vm498_vm0, %v9545_v60, 0.0 }
 0xd1b   : > { %5922 = vadd.xlane.f32.xlu1 %v5921_v7  ;;  %v5918_v8 = vsel %vm498_vm0, %v9548_v5, 0.0 }
 0xd1c   : > { %5919 = vadd.xlane.f32.xlu0 %v5918_v8 }
 0xda8   : > { %v5923_v9 = vpop.xlane.xlu1 %5922 }
 0xda9   : > { %v5925_v11 = vmul.f32 0.03125, %v5923_v9  ;;  %v5920_v12 = vpop.xlane.xlu0 %5919 }
 0xdaa   : > { %v5924_v13 = vmul.f32 0.03125, %v5920_v12 }
 0xdab   : > { %v9555_v14 = vsub.f32 %v9545_v60, %v5925_v11  ;;  %v7242_v11 = vld [vmem:[%s9753_s8] ss:$0 sm:$0xff] }
 0xdac   : > { %v9558_v6 = vsub.f32 %v9548_v5, %v5924_v13 }
 0xdad   : > { %v5929_v17 = vmul.f32 %v9555_v14, %v9555_v14 }
 0xdae   : > { %v5928_v15 = vmul.f32 %v9558_v6, %v9558_v6  ;;  %v5945_v12 = vmul.f32 %v7242_v11, %v9558_v6 }
 0xdaf   : > { %v5933_v18 = vsel %vm498_vm0, %v5929_v17, 0.0  ;;  %v5946_v17 = vmul.f32 %v7242_v11, %v9555_v14  ;;  %v6525_v14 = vld [vmem:[%s9757_s12 + $0x10] sm:$0xff] }
 0xdb0   : > { %v5930_v16 = vsel %vm498_vm0, %v5928_v15, 0.0  ;;  %v7243_v15 = vld [vmem:[%s9754_s9] ss:$0 sm:$0xff]  ;;  %v6552_v34 = vand.u32 4294901760, %v6525_v14 }
 0xdb1   : > { %5931 = vadd.xlane.f32.xlu0 %v5930_v16 }
 0xdb5   : > { %5934 = vadd.xlane.f32.xlu0 %v5933_v18 }
 0xe3e   : > { %v5932_v43 = vpop.xlane.xlu0 %5931 }
 0xe3f   : > { %v5936_v57 = vmul.f32 0.032258064, %v5932_v43 }
 0xe41   : > { %8938 = vrsqrt.f32 %v5936_v57  ;;  %vm5949_vm10 = vcmp.eq.f32.partialorder %v5936_v57, inf  ;;  %v5952_v63 = vand.u32 2147483648, %v5936_v57  ;;  %vm5951_vm11 = vcmp.eq.f32.partialorder %v5936_v57, 0.0 }
 0xe42   : > { %v5935_v58 = vpop.xlane.xlu0 %5934 }
 0xe43   : > { %v5937_v44 = vmul.f32 0.032258064, %v5935_v58 }
 0xe45   : > { %8940 = vrsqrt.f32 %v5937_v44  ;;  %vm5956_vm12 = vcmp.eq.f32.partialorder %v5937_v44, inf  ;;  %v5959_v4 = vand.u32 2147483648, %v5937_v44  ;;  %vm5958_vm13 = vcmp.eq.f32.partialorder %v5937_v44, 0.0 }
 0xe4b   : > { %v8939_v61 = vpop.eup %8938 }
 0xe4c   : > { %v5948_v62 = vmul.f32 %v8939_v61, %v5936_v57 }
 0xe4e   : > { %v5950_v0 = vsel %vm5949_vm10, %v5936_v57, %v5948_v62 }
 0xe4f   : > { %v8941_v1 = vpop.eup %8940  ;;  %v5953_v59 = vsel %vm5951_vm11, %v5952_v63, %v5950_v0 }
 0xe50   : > { %v5961_v2 = vadd.f32 1e-06, %v5953_v59  ;;  %v5955_v3 = vmul.f32 %v8941_v1, %v5937_v44  ;;  %v6675_v1 = vsub.f32 %v6528_v36, %v6561_v38 }
 0xe52   : > { %8942 = vrcp.f32 %v5961_v2  ;;  %v5957_v7 = vsel %vm5956_vm12, %v5937_v44, %v5955_v3  ;;  %v6654_v44 = vsub.f32 %v6525_v14, %v6552_v34 }
 0xe53   : > { %v5960_v8 = vsel %vm5958_vm13, %v5959_v4, %v5957_v7  ;;  %v6676_v7 = vand.u32 4294901760, %v6675_v1 }
 0xe54   : > { %v5962_v9 = vadd.f32 1e-06, %v5960_v8  ;;  %v6655_v62 = vand.u32 4294901760, %v6654_v44 }
 0xe56   : > { %8944 = vrcp.f32 %v5962_v9  ;;  %v6656_v63 = vsub.f32 %v6654_v44, %v6655_v62 }
 0xe58   : > { %v6657_v3 = vand.u32 4294901760, %v6656_v63 }
 0xe5c   : > { %v8943_v13 = vpop.eup %8942 }
 0xe5d   : > { %v5964_v16 = vmul.f32 %v8943_v13, %v5945_v12  ;;  %v6677_v12 = vsub.f32 %v6675_v1, %v6676_v7  ;;  %v6682_v13 = vsub.f32 %v6529_v40, %v6564_v42 }
 0xe5f   : > { %v5974_v18 = vadd.f32 %v7243_v15, %v5964_v16  ;;  %v6689_v16 = vsub.f32 %v6530_v41, %v6567_v47 }
 0xe60   : > { %v8945_v19 = vpop.eup %8944 }
 0xe61   : > { %v5966_v20 = vmul.f32 %v8945_v19, %v5946_v17  ;;  %v5988_v10 = vsel %vm498_vm0, %v5974_v18, 0  ;;  %v6678_v18 = vand.u32 4294901760, %v6677_v12  ;;  %v6683_v19 = vand.u32 4294901760, %v6682_v13 }
 0xe62   : > { %v6062_v22 = vand.u32 4294901760, %v5988_v10 }
 0xe63   : > { %v5975_v21 = vadd.f32 %v7243_v15, %v5966_v20  ;;  %v6690_v20 = vand.u32 4294901760, %v6689_v16 }
 0xe64   : > { %v6063_v23 = vsub.f32 %v5988_v10, %v6062_v22 }
 0xe65   : > { %v5991_v25 = vsel %vm498_vm0, %v5975_v21, 0  ;;  %v8673_v21 = vpack.c.bf16 %v6690_v20, %v6683_v19 }
 0xe66   : > { %v6064_v27 = vand.u32 4294901760, %v6063_v23  ;;  %v6072_v6 = vand.u32 4294901760, %v5991_v25 }
 0xe68   : > { %v6065_v24 = vsub.f32 %v6063_v23, %v6064_v27  ;;  %v6073_v30 = vsub.f32 %v5991_v25, %v6072_v6 }
 0xe6a   : > { %v6066_v46 = vand.u32 4294901760, %v6065_v24  ;;  %v6074_v45 = vand.u32 4294901760, %v6073_v30 }
 0xe6c   : > { %8089 = vmatprep.mubr.f32.mxu1 %v6066_v46  ;;  %v6075_v31 = vsub.f32 %v6073_v30, %v6074_v45 }
 0xe6e   : > { %v6076_v32 = vand.u32 4294901760, %v6075_v31  ;;  %v7244_v31 = vld [vmem:[%s9756_s11] ss:$0 sm:$0xff] }
 0xe70   : > { %8090 = vmatmul.mubr.f32.vlgmr.msra.gmra.mrb[8].mxu1 %v6076_v32 }
 0xe71   : > { %8560 = vmatpush3.bf16.msra.mxu1 %v9574_v39  ;;  %8100 = vmatprep.mubr.f32.mxu1 %v6062_v22 }
 0xe72   : > { %8562 = vmatprep.subr.bf16.mxu1 %v8561_v26 }
 0xe75   : > { %8564 = vmatpush3.bf16.msra.mxu1 %v8561_v26  ;;  %v9664_v26 = vpack.c.bf16 %v6567_v47, %v6564_v42 }
 0xe76   : > { %8566 = vmatprep.subr.bf16.mxu1 %v9577_v48 }
 0xe78   : > { %8101 = vmatmul.mubr.f32.vlgmr.msra.gmra.mrb[8].mxu1 %v6072_v6 }
 0xe79   : > { %8568 = vmatpush3.bf16.msra.mxu1 %v9577_v48  ;;  %8111 = vmatprep.mubr.f32.mxu1 %v6063_v23  ;;  %v6640_v48 = vsub.f32 %v9588_v52, %v6546_v54  ;;  %v6691_v23 = vsub.f32 %v6689_v16, %v6690_v20 }
 0xe7a   : > { %8570 = vmatprep.subr.bf16.mxu1 %v9579_v49 }
 0xe7d   : > { %8572 = vmatpush3.bf16.msra.mxu1 %v9579_v49  ;;  %v6647_v49 = vsub.f32 %v9593_v53, %v6549_v55 }
 0xe7e   : > { %8574 = vmatprep.subr.bf16.mxu1 %v9566_v28 }
 0xe7f   : > { %v8629_v24 = vpack.c.bf16 %v6647_v49, %v6640_v48 }
 0xe80   : > { %8112 = vmatmul.mubr.f32.vlgmr.msra.gmra.mrb[8].mxu1 %v6073_v30 }
 0xe81   : > { %8576 = vmatpush3.bf16.msra.mxu1 %v9566_v28  ;;  %8122 = vmatprep.mubr.f32.mxu1 %v6064_v27  ;;  %v6692_v27 = vand.u32 4294901760, %v6691_v23 }
 0xe82   : > { %8578 = vmatprep.subr.bf16.mxu1 %v9568_v29 }
 0xe85   : > { %8580 = vmatpush3.bf16.msra.mxu1 %v9568_v29 }
 0xe86   : > { %8582 = vmatprep.subr.bf16.mxu1 %v9581_v50 }
 0xe88   : > { %8123 = vmatmul.mubr.f32.vlgmr.msra.gmra.mrb[8].mxu1 %v6074_v45  ;;  %v8641_v45 = vpack.c.bf16 %v6689_v16, %v6682_v13 }
 0xe89   : > { %8584 = vmatpush3.bf16.msra.mxu1 %v9581_v50  ;;  %8133 = vmatprep.mubr.f32.mxu1 %v6062_v22  ;;  %v6641_v50 = vand.u32 4294901760, %v6640_v48 }
 0xe8a   : > { %8586 = vmatprep.subr.bf16.mxu1 %v9583_v51 }
 0xe8b   : > { %v6642_v57 = vsub.f32 %v6640_v48, %v6641_v50 }
 0xe8d   : > { %8588 = vmatpush3.bf16.msra.mxu1 %v9583_v51  ;;  %v6648_v51 = vand.u32 4294901760, %v6647_v49  ;;  %v6643_v52 = vand.u32 4294901760, %v6642_v57 }
 0xe8e   : > { %8590 = vmatprep.subr.bf16.mxu1 %v9566_v28 }
 0xe8f   : > { %v8661_v43 = vpack.c.bf16 %v6648_v51, %v6641_v50  ;;  %v6649_v58 = vsub.f32 %v6647_v49, %v6648_v51 }
 0xe90   : > { %8134 = vmatmul.mubr.f32.vlgmr.msra.gmra.mrb[8].mxu1 %v6072_v6 }
 0xe91   : > { %8592 = vmatpush3.bf16.msra.mxu1 %v9566_v28  ;;  %8144 = vmatprep.mubr.f32.mxu1 %v6062_v22  ;;  %v6555_v28 = vand.u32 4294901760, %v6526_v33  ;;  %v6650_v54 = vand.u32 4294901760, %v6649_v58  ;;  %v6684_v22 = vsub.f32 %v6682_v13, %v6683_v19 }
 0xe92   : > { %8594 = vmatprep.subr.bf16.mxu1 %v9568_v29 }
 0xe93   : > { %v9640_v35 = vpack.c.bf16 %v6555_v28, %v6552_v34  ;;  %v6661_v61 = vsub.f32 %v6526_v33, %v6555_v28  ;;  %v8613_v55 = vpack.c.bf16 %v6650_v54, %v6643_v52  ;;  %v6685_v25 = vand.u32 4294901760, %v6684_v22 }
 0xe95   : > { %8596 = vmatpush3.bf16.msra.mxu1 %v9568_v29  ;;  %v6527_v29 = vld [vmem:[%s9757_s12 + $0x20] sm:$0xff]  ;;  %8650 = vmatprep.subr.bf16.mxu0 %v9640_v35  ;;  %v6662_v53 = vand.u32 4294901760, %v6661_v61  ;;  %v8633_v30 = vpack.c.bf16 %v6661_v61, %v6654_v44 }
 0xe96   : > { %8598 = vmatprep.subr.bf16.mxu1 %v9601_v56  ;;  %v6558_v37 = vand.u32 4294901760, %v6527_v29  ;;  %8652 = vmatpush3.bf16.msra.mxu0 %v9640_v35 }
 0xe97   : > { %v8665_v59 = vpack.c.bf16 %v6662_v53, %v6655_v62  ;;  %v6663_v2 = vsub.f32 %v6661_v61, %v6662_v53 }
 0xe98   : > { %8145 = vmatmul.mubr.f32.vlgmr.msra.gmra.mrb[8].mxu1 %v6072_v6  ;;  %v9652_v39 = vpack.c.bf16 %v6561_v38, %v6558_v37  ;;  %v6668_v0 = vsub.f32 %v6527_v29, %v6558_v37  ;;  %v8625_v6 = vpack.c.bf16 %v6692_v27, %v6685_v25 }
 0xe99   : > { %8600 = vmatpush3.bf16.msra.mxu1 %v9601_v56  ;;  %v6664_v8 = vand.u32 4294901760, %v6663_v2 }
 0xe9a   : > { %8602 = vmatprep.subr.bf16.mxu1 %v9640_v35  ;;  %8654 = vmatprep.subr.bf16.mxu0 %v9652_v39  ;;  %v6669_v4 = vand.u32 4294901760, %v6668_v0  ;;  %v8637_v46 = vpack.c.bf16 %v6675_v1, %v6668_v0 }
 0xe9b   : > { %8656 = vmatpush3.bf16.msra.mxu0 %v9652_v39  ;;  %v8617_v15 = vpack.c.bf16 %v6664_v8, %v6657_v3 }
 0xe9c   : > { %8658 = vmatprep.subr.bf16.mxu0 %v9664_v26  ;;  %v8669_v9 = vpack.c.bf16 %v6676_v7, %v6669_v4  ;;  %v6670_v11 = vsub.f32 %v6668_v0, %v6669_v4 }
 0xe9d   : > { %8604 = vmatpush3.bf16.msra.mxu1 %v9640_v35 }
 0xe9e   : > { %8606 = vmatprep.subr.bf16.mxu1 %v9652_v39  ;;  %v6671_v17 = vand.u32 4294901760, %v6670_v11 }
 0xe9f   : > { %8660 = vmatpush3.bf16.msra.mxu0 %v9664_v26 }
 0xea0   : > { %8662 = vmatprep.subr.bf16.mxu0 %v8661_v43  ;;  %v8621_v10 = vpack.c.bf16 %v6678_v18, %v6671_v17 }
 0xea1   : > { %8608 = vmatpush3.bf16.msra.mxu1 %v9652_v39 }
 0xea2   : > { %8610 = vmatprep.subr.bf16.mxu1 %v9664_v26 }
 0xea5   : > { %8612 = vmatpush3.bf16.msra.mxu1 %v9664_v26 }
 0xea6   : > { %8614 = vmatprep.subr.bf16.mxu1 %v8613_v55 }
 0xf6b   : > { %v8146_v32 = vpop.f32.mrb[8].mxu1 }
 0xf6c   : > { %v8697_v14 = vadd.f32 %v8146_v32, %v7244_v31  ;;  %v6511_v33 = vpop.f32.mrb[9].mxu1 }
 0xf6d   : > { %v8698_v34 = vadd.f32 %v7244_v31, %v6511_v33 }
 0xf6e   : > { %v6522_v28 = vmax.f32 %v8697_v14, 0.0 }
 0xf6f   : > { %v6521_v29 = vmax.f32 %v8698_v34, 0.0 }
 0xf70   : > { %v6543_v36 = vsel %vm6538_vm14, %v6522_v28, 0 }
 0xf71   : > { %v6628_v37 = vand.u32 4294901760, %v6543_v36  ;;  %v6540_v38 = vsel %vm6538_vm14, %v6521_v29, 0 }
 0xf72   : > { %v6618_v40 = vand.u32 4294901760, %v6540_v38 }
 0xf73   : > { %v6629_v41 = vsub.f32 %v6543_v36, %v6628_v37 }
 0xf74   : > { %v6619_v42 = vsub.f32 %v6540_v38, %v6618_v40 }
 0xf75   : > { %v6630_v47 = vand.u32 4294901760, %v6629_v41 }
 0xf76   : > { %v6620_v48 = vand.u32 4294901760, %v6619_v42 }
 0xf77   : > { %v6631_v49 = vsub.f32 %v6629_v41, %v6630_v47 }
 0xf78   : > { %8220 = vmatprep.mubr.f32.mxu0 %v6620_v48  ;;  %v6621_v50 = vsub.f32 %v6619_v42, %v6620_v48 }
 0xf79   : > { %8221 = vmatmul.mubr.f32.vlgmr.msra.gmra.mrb[12].mxu0 %v6630_v47  ;;  %v6632_v57 = vand.u32 4294901760, %v6631_v49 }
 0xf7a   : > { %8664 = vmatpush3.bf16.msra.mxu0 %v8661_v43  ;;  %8239 = vmatprep.mubr.f32.mxu0 %v6618_v40  ;;  %v6622_v51 = vand.u32 4294901760, %v6621_v50  ;;  %v7245_v43 = vld [vmem:[%s9758_s13] ss:$0 sm:$0xff] }
 0xf7b   : > { %8666 = vmatprep.subr.bf16.mxu0 %v8665_v59 }
 0xf7c   : > { %8163 = vmatprep.mubr.f32.mxu1 %v6622_v51 }
 0xf7d   : > { %8164 = vmatmul.mubr.f32.vlgmr.msra.gmra.mrb[10].mxu1 %v6632_v57 }
 0xf7e   : > { %8616 = vmatpush3.bf16.msra.mxu1 %v8613_v55  ;;  %8668 = vmatpush3.bf16.msra.mxu0 %v8665_v59 }
 0xf7f   : > { %8182 = vmatprep.mubr.f32.mxu1 %v6618_v40  ;;  %8618 = vmatprep.subr.bf16.mxu1 %v8617_v15 }
 0xf80   : > { %8670 = vmatprep.subr.bf16.mxu0 %v8669_v9 }
 0xf82   : > { %8620 = vmatpush3.bf16.msra.mxu1 %v8617_v15  ;;  %8672 = vmatpush3.bf16.msra.mxu0 %v8669_v9 }
 0xf83   : > { %8622 = vmatprep.subr.bf16.mxu1 %v8621_v10  ;;  %8674 = vmatprep.subr.bf16.mxu0 %v8673_v21 }
 0xf86   : > { %8624 = vmatpush3.bf16.msra.mxu1 %v8621_v10  ;;  %8676 = vmatpush3.bf16.msra.mxu0 %v8673_v21 }
 0xf87   : > { %8626 = vmatprep.subr.bf16.mxu1 %v8625_v6  ;;  %8678 = vmatprep.subr.bf16.mxu0 %v9601_v56 }
 0xf89   : > { %8240 = vmatmul.mubr.f32.vlgmr.msra.gmra.mrb[12].mxu0 %v6628_v37 }
 0xf8a   : > { %8628 = vmatpush3.bf16.msra.mxu1 %v8625_v6  ;;  %8680 = vmatpush3.bf16.msra.mxu0 %v9601_v56 }
 0xf8b   : > { %8258 = vmatprep.mubr.f32.mxu0 %v6618_v40  ;;  %8630 = vmatprep.subr.bf16.mxu1 %v8629_v24 }
 0xf8c   : > { %8682 = vmatprep.subr.bf16.mxu0 %v9640_v35 }
 0xf8d   : > { %8183 = vmatmul.mubr.f32.vlgmr.msra.gmra.mrb[10].mxu1 %v6628_v37 }
 0xf8e   : > { %8632 = vmatpush3.bf16.msra.mxu1 %v8629_v24  ;;  %8201 = vmatprep.mubr.f32.mxu1 %v6619_v42 }
 0xf8f   : > { %8684 = vmatpush3.bf16.msra.mxu0 %v9640_v35  ;;  %8634 = vmatprep.subr.bf16.mxu1 %v8633_v30 }
 0xf90   : > { %8686 = vmatprep.subr.bf16.mxu0 %v9652_v39 }
 0xf92   : > { %8636 = vmatpush3.bf16.msra.mxu1 %v8633_v30 }
 0xf93   : > { %8688 = vmatpush3.bf16.msra.mxu0 %v9652_v39  ;;  %8638 = vmatprep.subr.bf16.mxu1 %v8637_v46 }
 0xf94   : > { %8690 = vmatprep.subr.bf16.mxu0 %v9664_v26 }
 0xf96   : > { %8640 = vmatpush3.bf16.msra.mxu1 %v8637_v46 }
 0xf97   : > { %8692 = vmatpush3.bf16.msra.mxu0 %v9664_v26  ;;  %8642 = vmatprep.subr.bf16.mxu1 %v8641_v45 }
 0xf9a   : > { %8259 = vmatmul.mubr.f32.vlgmr.msra.gmra.mrb[12].mxu0 %v6628_v37  ;;  %8644 = vmatpush3.bf16.msra.mxu1 %v8641_v45 }
 0xf9d   : > { %8202 = vmatmul.mubr.f32.vlgmr.msra.gmra.mrb[10].mxu1 %v6629_v41 }
0x106d   : > { %v8260_v56 = vpop.f32.mrb[12].mxu0 }
0x106e   : > { %v7115_v35 = vpop.f32.mrb[13].mxu0 }
0x1070   : > { %v8203_v39 = vpop.f32.mrb[10].mxu1 }
0x1071   : > { %v8699_v58 = vadd.f32 %v8203_v39, %v7245_v43  ;;  %v6839_v44 = vpop.f32.mrb[11].mxu1 }
0x1072   : > { %v8701_v61 = vadd.f32 %v7245_v43, %v6839_v44 }
0x1073   : > { %v8700_v52 = vadd.f32 %v8699_v58, %v8260_v56 }
0x1074   : > { %v8702_v26 = vadd.f32 %v8701_v61, %v7115_v35 }
0x1075   : > { %v7126_v54 = vadd.f32 %v8700_v52, %v9545_v60 }
0x1076   : > { %v7125_v62 = vadd.f32 %v8702_v26, %v9548_v5 }
0x1077   : > { %7128 = vst.msk [vmem:[%s490_s19 + $0x8] sm:$0xff] %vm498_vm0, %v7126_v54 }
0x1078   : > { %7127 = vst.msk [vmem:[%s490_s19] sm:$0xff] %vm498_vm0, %v7125_v62 }
0x1079   : > { %9017 = shalt.err (!%p9014_p11)
}
0x107a   : > { %s9018_s21 = scalar_lea.hbm %s9696_s29, 256  ;;  %s9022_s19 = scalar_lea.hbm %s9790_s22, 512 }
0x107b   : > { %p9019_p13 = scmp.ne.s32.totalorder %s9696_s29, %s9018_s21  ;;  %p9023_p6 = scmp.lt.u32.totalorder %s9696_s29, %s9790_s22 }
0x107c   : > { %p9024_p9 = scmp.lt.u32.totalorder %s9022_s19, %s9018_s21  ;;  %p9026_p12 = scmp.lt.u32.totalorder %s9018_s21, %s9696_s29 }
0x107d   : > { %p9020_p5 = pnand %p9019_p13, %p9791_p1 }
0x107e   : > { %p9025_p10 = por %p9024_p9, %p9023_p6 }
0x107f   : > { %p9021_p0 = pneg %p9020_p5 }
0x1080   : > { %p9027_p2 = por %p9026_p12, %p9025_p10 }
0x1082   : > { %p9028_p3 = pnand %p9027_p2, %p9021_p0 }
0x1084   : > { %9031 = shalt.err (!%p9028_p3)
}
0x1085   : > { %s9095_s15 = smov 128  }
0x1086   : > { %8829 = dma.vmem_to_hbm [thread:$0]  (%p9791_p1), %s9699_s23, 256, %s9696_s29, %s9703_s17, %s9095_s15, %s9095_s15, %s9091_s28  }
0x1087 PF: > { %s9792_s24 = sld [smem:[#allocation13_spill]]  ;;  %s9793_s26 = sld [smem:[#allocation11_spill]] }
0x1088   : > { %s9794_s18 = sld [smem:[#allocation17_spill]] }
0x108d   : > { %p8846_p4 = scmp.ge.s32.totalorder %s9792_s24, 2  ;;  %s7158_s27 = sand.u32 1, %s9793_s26  }
0x108e   : > { %p9795_p7 = scmp.ne.s32.totalorder %s9794_s18, 0  ;;  %s7159_s21 = scalar_lea.sflag [#allocation4], %s7158_s27 }
0x1090   : > { %p8839_p8 = pnand %p8846_p4, %p9795_p7 }
0x1092   : > { %9057 = dma.done.wait (!%p8839_p8), %s7159_s21, 256  }
0x1093   : > { %9059 = vsyncadd (!%p8839_p8), %s7159_s21, 4294967040  ;;  %s9796_s16 = sld [smem:[#allocation14_spill]]  ;;  %s9797_s19 = sld [smem:[#allocation12_spill]] }
0x1094   : > { %s9798_s15 = sld [smem:[#allocation15_spill]]  ;;  %s9799_s29 = smov %s9066_s30 }
0x1099   : > { %p26_p11 = scmp.ge.s32.totalorder %s9796_s16, 4   ;;  %s9800_s30 = smov %s9797_s19 }
0x109b   :  { %28 = sbr.rel (!%p26_p11) target bundleno = 7 (0x7), region = 120 }
0x10a2   :  { %7164 = vsyncpa [#allocation3], 1 }
0x10a3   :  { %7166 = vsyncpa [#allocation3 + $0x1], 1 }
0x10a4   :  { %7167 = vsyncpa [#allocation6], 1 }
0x10a5   :  { %7168 = vsyncpa [#allocation4], 1 }
0x10a6   :  { %7170 = vsyncpa [#allocation4 + $0x1], 1 }

</bundles_post_ra>
